<compile_context>
chip_gen: v5e
topology: v5e:2x2
jax: 0.10.0
libtpu: 0.0.40
codegen_flags: <defaults>
</compile_context>

<pallas_src>
import numpy as np
import jax
import jax.numpy as jnp
from jax.experimental import pallas as pl
from jax.experimental.pallas import tpu as pltpu

# ----------------------- module hyper-parameters (small) -----------------------
INPUT_DIM = 8
HIDDEN = 32
NUM_CONV_LAYERS = 1
KERNEL_SIZE = 3
DILATION = [2]
DROPOUT = 0.1          # inference -> identity
B = 2                  # batch
L = 16                 # sequence length

CONV_DILATIONS = [1] * NUM_CONV_LAYERS + list(DILATION)   # plain convs then dilated convs
N_CONV = len(CONV_DILATIONS)
N_BN = 1 + N_CONV + 1          # BN after input Linear, each conv, mid Linear
BN_EPS = 1e-5

# Batch elements per grid step.  At this toy size use the whole batch (one grid step);
# at real sizes use a multiple of 8 (so the output block satisfies sublane tiling) and
# keep BATCH_TILE*L >= 256 rows so the MXU stays fed.
BATCH_TILE = B
assert B % BATCH_TILE == 0


def pad_for(k, d):
    # PyTorch: plain conv uses k//2, dilated conv uses (k + (k-1)*(d-1) - 1)//2
    return (k + (k - 1) * (d - 1) - 1) // 2


MAXPAD = max(pad_for(KERNEL_SIZE, d) for d in CONV_DILATIONS)


# --------------------------------- kernel --------------------------------------
def dilated_cnn_kernel(x_ref, w_in_ref, b_in_ref,
                       conv_w_ref, conv_b_ref,
                       w_mid_ref, b_mid_ref,
                       w_out_ref, b_out_ref,
                       o_ref, pad_ref):
    BT, Ld, Din = x_ref.shape
    H = w_in_ref.shape[1]
    K = KERNEL_SIZE

    def mm(a, b):
        # exact-f32 MXU matmul; at real sizes switch operands to bf16 on v6e/v7x and
        # keep f32 accumulation via preferred_element_type.
        return jnp.dot(a, b, preferred_element_type=jnp.float32,
                       precision=jax.lax.Precision.HIGHEST)

    # ---- input Linear (eval-BN pre-folded into weights/bias) + ReLU ----
    x2 = x_ref[...].reshape(BT * Ld, Din)
    h = jnp.maximum(mm(x2, w_in_ref[...]) + b_in_ref[...], 0.0)      # (BT*L, H)

    # ---- zero only the 2*MAXPAD halo rows, once per grid step ----
    # (the interior [MAXPAD:MAXPAD+L] is fully overwritten every conv layer)
    if MAXPAD > 0:
        pad_ref[:, :MAXPAD, :] = jnp.zeros((BT, MAXPAD, H), jnp.float32)
        pad_ref[:, MAXPAD + Ld:, :] = jnp.zeros((BT, MAXPAD, H), jnp.float32)

    # ---- Conv1d blocks (plain + dilated), 'same' output length ----
    # Each layer: concatenate the K shifted windows along channels and do ONE
    # (BT*L, K*H) @ (K*H, H) MXU matmul (weights pre-packed as (K*H, H)).
    for ci, d in enumerate(CONV_DILATIONS):
        pad = pad_for(K, d)
        pad_ref[:, MAXPAD:MAXPAD + Ld, :] = h.reshape(BT, Ld, H)
        taps = []
        for t in range(K):
            start = MAXPAD - pad + t * d                              # static offset
            taps.append(pad_ref[:, start:start + Ld, :])              # (BT, L, H)
        xt_all = jnp.concatenate(taps, axis=-1).reshape(BT * Ld, K * H)
        h = jnp.maximum(mm(xt_all, conv_w_ref[ci]) + conv_b_ref[ci:ci + 1, :], 0.0)

    # ---- mid Linear (folded BN) + ReLU ----
    h = jnp.maximum(mm(h, w_mid_ref[...]) + b_mid_ref[...], 0.0)      # (BT*L, H)

    # ---- output Linear (H -> 1) + tanh, emitted lane-dense as (BT, L) ----
    h3 = h.reshape(BT, Ld, H)
    logits = jnp.sum(h3 * w_out_ref[...], axis=-1) + b_out_ref[...]   # (BT, L)
    o_ref[...] = jnp.tanh(logits)


# ------------------------------- wrapper ----------------------------------------
def _resident(shape):
    # full-array block whose index is constant across the grid -> fetched once,
    # stays resident in VMEM for every batch tile.
    n = len(shape)
    return pl.BlockSpec(shape, lambda b, _n=n: (0,) * _n)


@jax.jit
def dilated_cnn_forward(x, params):
    (w_in, b_in, conv_w, conv_b, w_mid, b_mid, w_out, b_out) = params
    weights = (w_in, b_in, conv_w, conv_b, w_mid, b_mid, w_out, b_out)
    bt = BATCH_TILE
    out = pl.pallas_call(
        dilated_cnn_kernel,
        out_shape=jax.ShapeDtypeStruct((B, L), jnp.float32),
        grid_spec=pltpu.PrefetchScalarGridSpec(
            num_scalar_prefetch=0,
            grid=(B // bt,),
            in_specs=[pl.BlockSpec((bt, L, INPUT_DIM), lambda b: (b, 0, 0))]
                     + [_resident(w.shape) for w in weights],
            out_specs=pl.BlockSpec((bt, L), lambda b: (b, 0)),
            scratch_shapes=[pltpu.VMEM((bt, L + 2 * MAXPAD, HIDDEN), jnp.float32)],
        ),
        compiler_params=pltpu.CompilerParams(dimension_semantics=("parallel",)),
    )(x, *weights)
    return out


# --------------------------- deterministic params -------------------------------
def init_raw_params(key):
    """Raw (unfolded) parameters mirroring the PyTorch module's init."""
    ks = jax.random.split(key, 5)

    def kaiming_uniform(k, shape, fan_in):
        bound = float(np.sqrt(6.0 / fan_in))          # kaiming_uniform_ (gain=sqrt(2))
        return jax.random.uniform(k, shape, jnp.float32, -bound, bound)

    # Linear weights stored already transposed: (in, out); biases zero-filled.
    w_in = kaiming_uniform(ks[0], (INPUT_DIM, HIDDEN), INPUT_DIM)
    b_in = jnp.zeros((1, HIDDEN), jnp.float32)

    # Conv weights in layout (layer, tap, Cin, Cout)
    conv_w = kaiming_uniform(ks[1], (N_CONV, KERNEL_SIZE, HIDDEN, HIDDEN),
                             HIDDEN * KERNEL_SIZE)
    conv_b = jnp.zeros((N_CONV, HIDDEN), jnp.float32)

    w_mid = kaiming_uniform(ks[2], (HIDDEN, HIDDEN), HIDDEN)
    b_mid = jnp.zeros((1, HIDDEN), jnp.float32)

    # output Linear(H, 1): xavier-normal weight, PyTorch-default uniform bias
    std = float(np.sqrt(2.0 / (1 + HIDDEN)))
    w_out = std * jax.random.normal(ks[3], (1, HIDDEN), jnp.float32)
    bb = 1.0 / float(np.sqrt(HIDDEN))
    b_out = jax.random.uniform(ks[4], (1, 1), jnp.float32, -bb, bb)

    # BatchNorm1d (eval): default affine params and running stats
    gamma = jnp.ones((N_BN, HIDDEN), jnp.float32)
    beta = jnp.zeros((N_BN, HIDDEN), jnp.float32)
    rmean = jnp.zeros((N_BN, HIDDEN), jnp.float32)
    rvar = jnp.ones((N_BN, HIDDEN), jnp.float32)
    return (w_in, b_in, conv_w, conv_b, w_mid, b_mid, w_out, b_out,
            gamma, beta, rmean, rvar)


def fold_bn_params(raw):
    """Fold eval-mode BN into the preceding Linear/Conv; pack conv weights (K*H, H)."""
    (w_in, b_in, conv_w, conv_b, w_mid, b_mid, w_out, b_out,
     gamma, beta, rmean, rvar) = raw
    s = gamma / jnp.sqrt(rvar + BN_EPS)              # (N_BN, H)
    sh = beta - rmean * s

    i = 0
    w_in_f = w_in * s[i][None, :]
    b_in_f = b_in * s[i][None, :] + sh[i][None, :]
    i += 1

    conv_w_f, conv_b_f = [], []
    for ci in range(N_CONV):
        conv_w_f.append(conv_w[ci] * s[i][None, None, :])
        conv_b_f.append(conv_b[ci] * s[i] + sh[i])
        i += 1
    # (N_CONV, K, Cin, Cout) -> (N_CONV, K*Cin, Cout): row index = tap*H + cin,
    # matching the in-kernel concat order of the K shifted windows.
    conv_w_f = jnp.stack(conv_w_f).reshape(N_CONV, KERNEL_SIZE * HIDDEN, HIDDEN)
    conv_b_f = jnp.stack(conv_b_f)                   # (N_CONV, H)

    w_mid_f = w_mid * s[i][None, :]
    b_mid_f = b_mid * s[i][None, :] + sh[i][None, :]

    return (w_in_f, b_in_f, conv_w_f, conv_b_f, w_mid_f, b_mid_f, w_out, b_out)


# ------------------------ float64 NumPy reference (unfolded) --------------------
def reference_forward_np(x, raw):
    (w_in, b_in, conv_w, conv_b, w_mid, b_mid, w_out, b_out,
     gamma, beta, rmean, rvar) = [np.asarray(p, np.float64) for p in raw]
    x = np.asarray(x, np.float64)

    def bn_relu(h, i):
        s = gamma[i] / np.sqrt(rvar[i] + BN_EPS)
        return np.maximum((h - rmean[i]) * s + beta[i], 0.0)

    h = x @ w_in + b_in                              # (B, L, H)
    h = bn_relu(h, 0)
    bi = 1
    for ci, d in enumerate(CONV_DILATIONS):
        pad = pad_for(KERNEL_SIZE, d)
        hp = np.pad(h, ((0, 0), (pad, pad), (0, 0)))
        acc = np.broadcast_to(conv_b[ci], h.shape).copy()
        for t in range(KERNEL_SIZE):
            acc = acc + hp[:, t * d:t * d + L, :] @ conv_w[ci, t]
        h = bn_relu(acc, bi)
        bi += 1
    h = h @ w_mid + b_mid
    h = bn_relu(h, bi)
    logits = np.sum(h * w_out[0], axis=-1) + b_out[0, 0]
    return np.tanh(logits)                           # (B, L)


if __name__ == "__main__":
    key = jax.random.PRNGKey(0)
    kx, kp = jax.random.split(key)
    x = jax.random.normal(kx, (B, L, INPUT_DIM), jnp.float32)
    raw = init_raw_params(kp)
    params = fold_bn_params(raw)

    out = dilated_cnn_forward(x, params)
    out = jax.block_until_ready(out)
    assert out.shape == (B, L), out.shape

    ref = reference_forward_np(x, raw)
    # all-f32 HIGHEST-precision path vs f64 reference agrees to ~1e-6; 1e-4 leaves
    # headroom for the EUP tanh approximation while still catching real regressions.
    np.testing.assert_allclose(np.asarray(out), ref, atol=1e-4, rtol=1e-4)

    print("KERNEL_OK")
</pallas_src>

<mosaic_0001>
module attributes {stable_mosaic.version = 11 : i64} {
  func.func @dilated_cnn_kernel(%arg0: i32, %arg1: memref<2x16x8xf32, #tpu.memory_space<vmem>>, %arg2: memref<8x32xf32, #tpu.memory_space<vmem>>, %arg3: memref<1x32xf32, #tpu.memory_space<vmem>>, %arg4: memref<2x96x32xf32, #tpu.memory_space<vmem>>, %arg5: memref<2x32xf32, #tpu.memory_space<vmem>>, %arg6: memref<32x32xf32, #tpu.memory_space<vmem>>, %arg7: memref<1x32xf32, #tpu.memory_space<vmem>>, %arg8: memref<1x32xf32, #tpu.memory_space<vmem>>, %arg9: memref<1x1xf32, #tpu.memory_space<vmem>>, %arg10: memref<2x16xf32, #tpu.memory_space<vmem>>, %arg11: memref<2x20x32xf32, #tpu.memory_space<vmem>>) attributes {dimension_semantics = [#tpu.dimension_semantics<parallel>], iteration_bounds = array<i64: 1>, scalar_prefetch = 0 : i64, scratch_operands = 1 : i64, tpu.core_type = #tpu.core_type<tc>, window_params = [{transform_indices = @transform_0, window_bounds = array<i64: 2, 16, 8>}, {pipeline_mode = #tpu.pipeline_mode<synchronous>, transform_indices = @transform_1, window_bounds = array<i64: 8, 32>}, {pipeline_mode = #tpu.pipeline_mode<synchronous>, transform_indices = @transform_2, window_bounds = array<i64: 1, 32>}, {pipeline_mode = #tpu.pipeline_mode<synchronous>, transform_indices = @transform_3, window_bounds = array<i64: 2, 96, 32>}, {pipeline_mode = #tpu.pipeline_mode<synchronous>, transform_indices = @transform_4, window_bounds = array<i64: 2, 32>}, {pipeline_mode = #tpu.pipeline_mode<synchronous>, transform_indices = @transform_5, window_bounds = array<i64: 32, 32>}, {pipeline_mode = #tpu.pipeline_mode<synchronous>, transform_indices = @transform_6, window_bounds = array<i64: 1, 32>}, {pipeline_mode = #tpu.pipeline_mode<synchronous>, transform_indices = @transform_7, window_bounds = array<i64: 1, 32>}, {pipeline_mode = #tpu.pipeline_mode<synchronous>, transform_indices = @transform_8, window_bounds = array<i64: 1, 1>}, {transform_indices = @transform_9, window_bounds = array<i64: 2, 16>}]} {
    %c0 = arith.constant 0 : index
    %c0_0 = arith.constant 0 : index
    %c0_1 = arith.constant 0 : index
    %0 = vector.load %arg1[%c0, %c0_0, %c0_1] : memref<2x16x8xf32, #tpu.memory_space<vmem>>, vector<2x16x8xf32>
    %1 = vector.shape_cast %0 : vector<2x16x8xf32> to vector<32x8xf32>
    %c0_2 = arith.constant 0 : index
    %c0_3 = arith.constant 0 : index
    %2 = vector.load %arg2[%c0_2, %c0_3] : memref<8x32xf32, #tpu.memory_space<vmem>>, vector<8x32xf32>
    %cst = arith.constant dense<0.000000e+00> : vector<32x32xf32>
    %3 = tpu.matmul %1, %2, %cst {dimension_numbers = #tpu.dot_dimension_numbers<[1], [0], [0], [1], [0, 0, 1, 1], [], []>, precision = #tpu.contract_precision<fp32>} : vector<32x8xf32>, vector<8x32xf32>, vector<32x32xf32> -> vector<32x32xf32>
    %c0_4 = arith.constant 0 : index
    %c0_5 = arith.constant 0 : index
    %4 = vector.load %arg3[%c0_4, %c0_5] : memref<1x32xf32, #tpu.memory_space<vmem>>, vector<1x32xf32>
    %5 = vector.broadcast %4 : vector<1x32xf32> to vector<32x32xf32>
    %6 = arith.addf %3, %5 : vector<32x32xf32>
    %cst_6 = arith.constant 0.000000e+00 : f32
    %7 = vector.broadcast %cst_6 : f32 to vector<32x32xf32>
    %8 = arith.maximumf %6, %7 : vector<32x32xf32>
    %cst_7 = arith.constant 0.000000e+00 : f32
    %9 = vector.broadcast %cst_7 : f32 to vector<2x2x32xf32>
    %c0_8 = arith.constant 0 : index
    %c0_9 = arith.constant 0 : index
    %c0_10 = arith.constant 0 : index
    %10 = vector.load %arg11[%c0_8, %c0_9, %c0_10] : memref<2x20x32xf32, #tpu.memory_space<vmem>>, vector<2x2x32xf32>
    tpu.vector_store %arg11[%c0_8, %c0_9, %c0_10], %9 {strides = array<i32>} : memref<2x20x32xf32, #tpu.memory_space<vmem>>, vector<2x2x32xf32>,
    %cst_11 = arith.constant 0.000000e+00 : f32
    %11 = vector.broadcast %cst_11 : f32 to vector<2x2x32xf32>
    %c0_12 = arith.constant 0 : index
    %c18 = arith.constant 18 : index
    %c0_13 = arith.constant 0 : index
    %12 = vector.load %arg11[%c0_12, %c18, %c0_13] : memref<2x20x32xf32, #tpu.memory_space<vmem>>, vector<2x2x32xf32>
    tpu.vector_store %arg11[%c0_12, %c18, %c0_13], %11 {strides = array<i32>} : memref<2x20x32xf32, #tpu.memory_space<vmem>>, vector<2x2x32xf32>,
    %13 = vector.shape_cast %8 : vector<32x32xf32> to vector<2x16x32xf32>
    %c0_14 = arith.constant 0 : index
    %c2 = arith.constant 2 : index
    %c0_15 = arith.constant 0 : index
    %14 = vector.load %arg11[%c0_14, %c2, %c0_15] : memref<2x20x32xf32, #tpu.memory_space<vmem>>, vector<2x16x32xf32>
    tpu.vector_store %arg11[%c0_14, %c2, %c0_15], %13 {strides = array<i32>} : memref<2x20x32xf32, #tpu.memory_space<vmem>>, vector<2x16x32xf32>,
    %c0_16 = arith.constant 0 : index
    %c1 = arith.constant 1 : index
    %c0_17 = arith.constant 0 : index
    %15 = vector.load %arg11[%c0_16, %c1, %c0_17] : memref<2x20x32xf32, #tpu.memory_space<vmem>>, vector<2x16x32xf32>
    %c0_18 = arith.constant 0 : index
    %c2_19 = arith.constant 2 : index
    %c0_20 = arith.constant 0 : index
    %16 = vector.load %arg11[%c0_18, %c2_19, %c0_20] : memref<2x20x32xf32, #tpu.memory_space<vmem>>, vector<2x16x32xf32>
    %c0_21 = arith.constant 0 : index
    %c3 = arith.constant 3 : index
    %c0_22 = arith.constant 0 : index
    %17 = vector.load %arg11[%c0_21, %c3, %c0_22] : memref<2x20x32xf32, #tpu.memory_space<vmem>>, vector<2x16x32xf32>
    %18 = tpu.concatenate %15, %16, %17 in 2 : vector<2x16x32xf32>, vector<2x16x32xf32>, vector<2x16x32xf32> -> vector<2x16x96xf32>
    %19 = vector.shape_cast %18 : vector<2x16x96xf32> to vector<32x96xf32>
    %c0_23 = arith.constant 0 : index
    %c0_24 = arith.constant 0 : index
    %c0_25 = arith.constant 0 : index
    %20 = vector.load %arg4[%c0_23, %c0_24, %c0_25] : memref<2x96x32xf32, #tpu.memory_space<vmem>>, vector<1x96x32xf32>
    %21 = vector.shape_cast %20 : vector<1x96x32xf32> to vector<96x32xf32>
    %cst_26 = arith.constant dense<0.000000e+00> : vector<32x32xf32>
    %22 = tpu.matmul %19, %21, %cst_26 {dimension_numbers = #tpu.dot_dimension_numbers<[1], [0], [0], [1], [0, 0, 1, 1], [], []>, precision = #tpu.contract_precision<fp32>} : vector<32x96xf32>, vector<96x32xf32>, vector<32x32xf32> -> vector<32x32xf32>
    %c0_27 = arith.constant 0 : index
    %c0_28 = arith.constant 0 : index
    %23 = vector.load %arg5[%c0_27, %c0_28] : memref<2x32xf32, #tpu.memory_space<vmem>>, vector<1x32xf32>
    %24 = vector.broadcast %23 : vector<1x32xf32> to vector<32x32xf32>
    %25 = arith.addf %22, %24 : vector<32x32xf32>
    %cst_29 = arith.constant 0.000000e+00 : f32
    %26 = vector.broadcast %cst_29 : f32 to vector<32x32xf32>
    %27 = arith.maximumf %25, %26 : vector<32x32xf32>
    %28 = vector.shape_cast %27 : vector<32x32xf32> to vector<2x16x32xf32>
    %c0_30 = arith.constant 0 : index
    %c2_31 = arith.constant 2 : index
    %c0_32 = arith.constant 0 : index
    %29 = vector.load %arg11[%c0_30, %c2_31, %c0_32] : memref<2x20x32xf32, #tpu.memory_space<vmem>>, vector<2x16x32xf32>
    tpu.vector_store %arg11[%c0_30, %c2_31, %c0_32], %28 {strides = array<i32>} : memref<2x20x32xf32, #tpu.memory_space<vmem>>, vector<2x16x32xf32>,
    %c0_33 = arith.constant 0 : index
    %c0_34 = arith.constant 0 : index
    %c0_35 = arith.constant 0 : index
    %30 = vector.load %arg11[%c0_33, %c0_34, %c0_35] : memref<2x20x32xf32, #tpu.memory_space<vmem>>, vector<2x16x32xf32>
    %c0_36 = arith.constant 0 : index
    %c2_37 = arith.constant 2 : index
    %c0_38 = arith.constant 0 : index
    %31 = vector.load %arg11[%c0_36, %c2_37, %c0_38] : memref<2x20x32xf32, #tpu.memory_space<vmem>>, vector<2x16x32xf32>
    %c0_39 = arith.constant 0 : index
    %c4 = arith.constant 4 : index
    %c0_40 = arith.constant 0 : index
    %32 = vector.load %arg11[%c0_39, %c4, %c0_40] : memref<2x20x32xf32, #tpu.memory_space<vmem>>, vector<2x16x32xf32>
    %33 = tpu.concatenate %30, %31, %32 in 2 : vector<2x16x32xf32>, vector<2x16x32xf32>, vector<2x16x32xf32> -> vector<2x16x96xf32>
    %34 = vector.shape_cast %33 : vector<2x16x96xf32> to vector<32x96xf32>
    %c1_41 = arith.constant 1 : index
    %c0_42 = arith.constant 0 : index
    %c0_43 = arith.constant 0 : index
    %35 = vector.load %arg4[%c1_41, %c0_42, %c0_43] : memref<2x96x32xf32, #tpu.memory_space<vmem>>, vector<1x96x32xf32>
    %36 = vector.shape_cast %35 : vector<1x96x32xf32> to vector<96x32xf32>
    %cst_44 = arith.constant dense<0.000000e+00> : vector<32x32xf32>
    %37 = tpu.matmul %34, %36, %cst_44 {dimension_numbers = #tpu.dot_dimension_numbers<[1], [0], [0], [1], [0, 0, 1, 1], [], []>, precision = #tpu.contract_precision<fp32>} : vector<32x96xf32>, vector<96x32xf32>, vector<32x32xf32> -> vector<32x32xf32>
    %c1_45 = arith.constant 1 : index
    %c0_46 = arith.constant 0 : index
    %38 = vector.load %arg5[%c1_45, %c0_46] : memref<2x32xf32, #tpu.memory_space<vmem>>, vector<1x32xf32>
    %39 = vector.broadcast %38 : vector<1x32xf32> to vector<32x32xf32>
    %40 = arith.addf %37, %39 : vector<32x32xf32>
    %cst_47 = arith.constant 0.000000e+00 : f32
    %41 = vector.broadcast %cst_47 : f32 to vector<32x32xf32>
    %42 = arith.maximumf %40, %41 : vector<32x32xf32>
    %c0_48 = arith.constant 0 : index
    %c0_49 = arith.constant 0 : index
    %43 = vector.load %arg6[%c0_48, %c0_49] : memref<32x32xf32, #tpu.memory_space<vmem>>, vector<32x32xf32>
    %cst_50 = arith.constant dense<0.000000e+00> : vector<32x32xf32>
    %44 = tpu.matmul %42, %43, %cst_50 {dimension_numbers = #tpu.dot_dimension_numbers<[1], [0], [0], [1], [0, 0, 1, 1], [], []>, precision = #tpu.contract_precision<fp32>} : vector<32x32xf32>, vector<32x32xf32>, vector<32x32xf32> -> vector<32x32xf32>
    %c0_51 = arith.constant 0 : index
    %c0_52 = arith.constant 0 : index
    %45 = vector.load %arg7[%c0_51, %c0_52] : memref<1x32xf32, #tpu.memory_space<vmem>>, vector<1x32xf32>
    %46 = vector.broadcast %45 : vector<1x32xf32> to vector<32x32xf32>
    %47 = arith.addf %44, %46 : vector<32x32xf32>
    %cst_53 = arith.constant 0.000000e+00 : f32
    %48 = vector.broadcast %cst_53 : f32 to vector<32x32xf32>
    %49 = arith.maximumf %47, %48 : vector<32x32xf32>
    %50 = vector.shape_cast %49 : vector<32x32xf32> to vector<2x16x32xf32>
    %c0_54 = arith.constant 0 : index
    %c0_55 = arith.constant 0 : index
    %51 = vector.load %arg8[%c0_54, %c0_55] : memref<1x32xf32, #tpu.memory_space<vmem>>, vector<1x32xf32>
    %52 = vector.shape_cast %51 : vector<1x32xf32> to vector<1x1x32xf32>
    %53 = vector.broadcast %52 : vector<1x1x32xf32> to vector<2x16x32xf32>
    %54 = arith.mulf %50, %53 : vector<2x16x32xf32>
    %cst_56 = arith.constant dense<0.000000e+00> : vector<2x16xf32>
    %55 = vector.multi_reduction <add>, %54, %cst_56 [2] : vector<2x16x32xf32> to vector<2x16xf32>
    %c0_57 = arith.constant 0 : index
    %c0_58 = arith.constant 0 : index
    %56 = vector.load %arg9[%c0_57, %c0_58] : memref<1x1xf32, #tpu.memory_space<vmem>>, vector<1x1xf32>
    %57 = vector.broadcast %56 : vector<1x1xf32> to vector<2x16xf32>
    %58 = arith.addf %55, %57 : vector<2x16xf32>
    %59 = math.tanh %58 : vector<2x16xf32>
    %c0_59 = arith.constant 0 : index
    %c0_60 = arith.constant 0 : index
    %60 = vector.load %arg10[%c0_59, %c0_60] : memref<2x16xf32, #tpu.memory_space<vmem>>, vector<2x16xf32>
    tpu.vector_store %arg10[%c0_59, %c0_60], %59 {strides = array<i32>} : memref<2x16xf32, #tpu.memory_space<vmem>>, vector<2x16xf32>,
    return
  }
  func.func @transform_0(%arg0: i32) -> (i32, i32, i32) {
    %c0_i32 = arith.constant 0 : i32
    %c0_i32_0 = arith.constant 0 : i32
    %c0_i32_1 = arith.constant 0 : i32
    return %arg0, %c0_i32, %c0_i32_0 : i32, i32, i32
  }
  func.func @transform_1(%arg0: i32) -> (i32, i32) {
    %c0_i32 = arith.constant 0 : i32
    %c0_i32_0 = arith.constant 0 : i32
    %c0_i32_1 = arith.constant 0 : i32
    return %c0_i32, %c0_i32_0 : i32, i32
  }
  func.func @transform_2(%arg0: i32) -> (i32, i32) {
    %c0_i32 = arith.constant 0 : i32
    %c0_i32_0 = arith.constant 0 : i32
    %c0_i32_1 = arith.constant 0 : i32
    return %c0_i32, %c0_i32_0 : i32, i32
  }
  func.func @transform_3(%arg0: i32) -> (i32, i32, i32) {
    %c0_i32 = arith.constant 0 : i32
    %c0_i32_0 = arith.constant 0 : i32
    %c0_i32_1 = arith.constant 0 : i32
    %c0_i32_2 = arith.constant 0 : i32
    return %c0_i32, %c0_i32_0, %c0_i32_1 : i32, i32, i32
  }
  func.func @transform_4(%arg0: i32) -> (i32, i32) {
    %c0_i32 = arith.constant 0 : i32
    %c0_i32_0 = arith.constant 0 : i32
    %c0_i32_1 = arith.constant 0 : i32
    return %c0_i32, %c0_i32_0 : i32, i32
  }
  func.func @transform_5(%arg0: i32) -> (i32, i32) {
    %c0_i32 = arith.constant 0 : i32
    %c0_i32_0 = arith.constant 0 : i32
    %c0_i32_1 = arith.constant 0 : i32
    return %c0_i32, %c0_i32_0 : i32, i32
  }
  func.func @transform_6(%arg0: i32) -> (i32, i32) {
    %c0_i32 = arith.constant 0 : i32
    %c0_i32_0 = arith.constant 0 : i32
    %c0_i32_1 = arith.constant 0 : i32
    return %c0_i32, %c0_i32_0 : i32, i32
  }
  func.func @transform_7(%arg0: i32) -> (i32, i32) {
    %c0_i32 = arith.constant 0 : i32
    %c0_i32_0 = arith.constant 0 : i32
    %c0_i32_1 = arith.constant 0 : i32
    return %c0_i32, %c0_i32_0 : i32, i32
  }
  func.func @transform_8(%arg0: i32) -> (i32, i32) {
    %c0_i32 = arith.constant 0 : i32
    %c0_i32_0 = arith.constant 0 : i32
    %c0_i32_1 = arith.constant 0 : i32
    return %c0_i32, %c0_i32_0 : i32, i32
  }
  func.func @transform_9(%arg0: i32) -> (i32, i32) {
    %c0_i32 = arith.constant 0 : i32
    %c0_i32_0 = arith.constant 0 : i32
    return %arg0, %c0_i32 : i32, i32
  }
}

</mosaic_0001>

<bundles_post_ra>
// kernel: dilated_cnn_forward.1
= control target key start
LH: loop header
LB: loop body
LE: loop exit
PB: predicated region body
PF: predicated region fallthrough
CT: control target
= control target key end

     0   :  { %s2159_s0 = inlined_call_operand.vmem [shape: f32[2,16,8], index: 0, kind: input, shape index: {}]   ;;  %s2160_s1 = inlined_call_operand.vmem [shape: f32[8,32], index: 1, kind: input, shape index: {}]   ;;  %s2161_s2 = inlined_call_operand.vmem [shape: f32[1,32], index: 2, kind: input, shape index: {}]   ;;  %s2162_s3 = inlined_call_operand.vmem [shape: f32[2,96,32], index: 3, kind: input, shape index: {}]   ;;  %s2163_s4 = inlined_call_operand.vmem [shape: f32[2,32], index: 4, kind: input, shape index: {}]   ;;  %s2164_s5 = inlined_call_operand.vmem [shape: f32[32,32], index: 5, kind: input, shape index: {}]   ;;  %s2165_s6 = inlined_call_operand.vmem [shape: f32[1,32], index: 6, kind: input, shape index: {}]   ;;  %s2166_s7 = inlined_call_operand.vmem [shape: f32[1,32], index: 7, kind: input, shape index: {}]   ;;  %s2167_s8 = inlined_call_operand.<no memory space> [shape: f32[1,1], index: 8, kind: input, shape index: {}]   ;;  %s2168_s9 = inlined_call_operand.hbm [shape: f32[2,16], index: 9, kind: output, shape index: {}]  }
   0x1   :  { %v14_v0 = vstv %s2167_s8 }
   0x2   :  { %15 = vst [vmem:[#allocation3] sm:$0x1] %v14_v0 }
   0x3   :  { %v39_v1 = vld [vmem:[%s2160_s1] sm:$0xff]  ;;  %vm44_vm0 = vcmask 64512   ;;  %v36_v3 = vld [vmem:[%s2159_s0 + $0x8] sm:$0xff]  ;;  %v37_v9 = vld [vmem:[%s2159_s0 + $0x10] sm:$0xff] }
   0x4   :  { %v35_v2 = vld [vmem:[%s2159_s0] sm:$0xff]  ;;  %v72_v4 = vand.u32 4294901760, %v39_v1  ;;  %v49_v6 = vsel %vm44_vm0, %v36_v3, 0  ;;  %v52_v14 = vsel %vm44_vm0, %v37_v9, 0 }
   0x5   :  { %v46_v5 = vsel %vm44_vm0, %v35_v2, 0  ;;  %v82_v8 = vand.u32 4294901760, %v49_v6 }
   0x6   :  { %v74_v7 = vand.u32 4294901760, %v46_v5  ;;  %v123_v10 = vsub.f32 %v39_v1, %v72_v4  ;;  %73 = vmatpush.msra.mxu0 %v72_v4  ;;  %200 = vmatpush.msra.mxu3 %v72_v4 }
   0x7   :  { %v83_v12 = vsub.f32 %v49_v6, %v82_v8 }
   0x8   :  { %v75_v11 = vsub.f32 %v46_v5, %v74_v7  ;;  %162 = vmatpush.msra.mxu2 %v123_v10  ;;  %v124_v13 = vand.u32 4294901760, %v123_v10 }
   0x9   :  { %16 = vsyncpa [#allocation5], 0  ;;  %v84_v18 = vand.u32 4294901760, %v83_v12  ;;  %v90_v19 = vand.u32 4294901760, %v52_v14  ;;  %v38_v22 = vld [vmem:[%s2159_s0 + $0x18] sm:$0xff]  ;;  %vm300_vm1 = vcmask 254976  }
   0xa   :  { %165 = vmatmul.f32.vlgmr.msra.gmra.mxu2 %v75_v11  ;;  %v76_v15 = vand.u32 4294901760, %v75_v11  ;;  %244 = vmatpush.msrb.mxu0 %v124_v13  ;;  %v125_v16 = vsub.f32 %v123_v10, %v124_v13  ;;  %v55_v25 = vsel %vm44_vm0, %v38_v22, 0  ;;  %v1676_v37 = vmov 0.0   ;;  %v1636_v40 = vld [vmem:[%s2161_s2] ss:$0 sm:$0xff]  ;;  %v374_v3 = vld [vmem:[%s2162_s3 + $0x58] sm:$0xff] }
   0xb   :  { %v85_v23 = vsub.f32 %v83_v12, %v84_v18  ;;  %v91_v24 = vsub.f32 %v52_v14, %v90_v19  ;;  %v98_v28 = vand.u32 4294901760, %v55_v25  ;;  %303 = vst.msk [vmem:[#allocation2 + $0x12] sm:$0x3] %vm300_vm1, %v1676_v37  ;;  %vm305_vm2 = vcmask 261120   ;;  %s1677_s23 = smov 32   ;;  %s1678_s24 = smov 64  }
   0xc   :  { %v77_v17 = vsub.f32 %v75_v11, %v76_v15  ;;  %204 = vmatmul.f32.vlgmr.msra.gmra.mxu3 %v76_v15  ;;  %v126_v20 = vand.u32 4294901760, %v125_v16  ;;  %301 = vst.msk [vmem:[#allocation2] sm:$0x3] %vm300_vm1, %v1676_v37  ;;  %v1763_v6 = vand.u32 4294901760, %v374_v3  ;;  %vm358_vm3 = vcmask 523264   ;;  %s1608_s13 = sshll.u32 %s2168_s9, 4  ;;  %s1609_s13 = int_to_ptr.hbm [resolvable:$true] %s1608_s13 }
   0xd   :  { %v86_v26 = vand.u32 4294901760, %v85_v23  ;;  %v92_v27 = vand.u32 4294901760, %v91_v24  ;;  %v99_v30 = vsub.f32 %v55_v25, %v98_v28  ;;  %302 = vst.msk [vmem:[#allocation2 + $0x18] sm:$0x3] %vm300_vm1, %v1676_v37  ;;  %vm377_vm4 = vcmask 785408  }
   0xe   :  { %v78_v21 = vand.u32 4294901760, %v77_v17  ;;  %127 = vmatpush.msra.mxu1 %v126_v20  ;;  %304 = vst.msk [vmem:[#allocation2 + $0x2a] sm:$0x3] %vm300_vm1, %v1676_v37  ;;  %395 = vmatpush.msrb.mxu2 %v1763_v6  ;;  %vm1591_vm5 = vcmask 130112   ;;  %vm1596_vm6 = vcmask 1041409   ;;  %vm1599_vm7 = vcmask 123904  }
   0xf   :  { %129 = vmatmul.f32.vlgmr.msra.gmra.mxu1 %v74_v7  ;;  %v93_v29 = vsub.f32 %v91_v24, %v92_v27  ;;  %v100_v32 = vand.u32 4294901760, %v99_v30 }
  0x10   :  { %79 = vmatmul.f32.vlgmr.msra.gmra.mxu0 %v78_v21  ;;  %278 = vmatpush.msrb.mxu1 %v72_v4  ;;  %v373_v4 = vld [vmem:[%s2162_s3 + $0x50] sm:$0xff] }
  0x11   :  { %v94_v31 = vand.u32 4294901760, %v93_v29  ;;  %v101_v33 = vsub.f32 %v99_v30, %v100_v32 }
  0x12   :  { %170 = vmatmul.f32.gmra.mxu2 %v83_v12  ;;  %v1769_v12 = vsub.f32 %v374_v3, %v1763_v6  ;;  %610 = vmatpush.msra.mxu1 %v1763_v6 }
  0x13   :  { %v102_v34 = vand.u32 4294901760, %v101_v33 }
  0x14   :  { %210 = vmatmul.f32.gmra.mxu3 %v84_v18  ;;  %v457_v15 = vand.u32 4294901760, %v1769_v12  ;;  %550 = vmatpush.msra.mxu0 %v1769_v12 }
  0x16   :  { %v458_v21 = vsub.f32 %v1769_v12, %v457_v15 }
  0x17   :  { %133 = vmatmul.f32.gmra.mxu1 %v82_v8 }
  0x18   :  { %87 = vmatmul.f32.gmra.mxu0 %v86_v26  ;;  %v459_v26 = vand.u32 4294901760, %v458_v21 }
  0x1a   :  { %175 = vmatmul.f32.gmra.mxu2 %v91_v24  ;;  %460 = vmatpush.msrb.mxu3 %v459_v26 }
  0x1c   :  { %216 = vmatmul.f32.gmra.mxu3 %v92_v27 }
  0x1f   :  { %137 = vmatmul.f32.gmra.mxu1 %v90_v19 }
  0x20   :  { %95 = vmatmul.f32.gmra.mxu0 %v94_v31 }
  0x22   :  { %180 = vmatmul.f32.gmra.mxu2 %v99_v30 }
  0x24   :  { %222 = vmatmul.f32.gmra.mxu3 %v100_v32 }
  0x27   :  { %141 = vmatmul.f32.gmra.mxu1 %v98_v28 }
  0x28   :  { %103 = vmatmul.f32.gmra.mxu0 %v102_v34 }
  0x2f   :  { %280 = vmatmul.f32.vlgmr.msrb.gmra.mxu1 %v74_v7 }
  0x30   :  { %246 = vmatmul.f32.vlgmr.msrb.gmra.mxu0 %v74_v7  ;;  %v1765_v7 = vand.u32 4294901760, %v373_v4 }
  0x32   :  { %v1772_v13 = vsub.f32 %v373_v4, %v1765_v7  ;;  %397 = vmatpush.msrb.mxu2 %v1765_v7  ;;  %612 = vmatpush.msra.mxu1 %v1765_v7 }
  0x34   :  { %v463_v16 = vand.u32 4294901760, %v1772_v13  ;;  %553 = vmatpush.msra.mxu0 %v1772_v13 }
  0x36   :  { %v464_v22 = vsub.f32 %v1772_v13, %v463_v16 }
  0x37   :  { %284 = vmatmul.f32.gmra.mxu1 %v82_v8 }
  0x38   :  { %250 = vmatmul.f32.gmra.mxu0 %v82_v8  ;;  %v465_v27 = vand.u32 4294901760, %v464_v22 }
  0x3a   :  { %466 = vmatpush.msrb.mxu3 %v465_v27 }
  0x3f   :  { %288 = vmatmul.f32.gmra.mxu1 %v90_v19 }
  0x40   :  { %254 = vmatmul.f32.gmra.mxu0 %v90_v19 }
  0x47   :  { %292 = vmatmul.f32.gmra.mxu1 %v98_v28 }
  0x48   :  { %258 = vmatmul.f32.gmra.mxu0 %v98_v28 }
  0x8c   :  { %v130_v36 = vpop.f32.mrf.mxu1 }
  0x8d   :  { %v80_v35 = vpop.f32.mrf.mxu0  ;;  %v166_v43 = vpop.f32.mrf.mxu2 }
  0x8e   :  { %v81_v44 = vadd.f32 %v1636_v40, %v80_v35 }
  0x8f   :  { %v205_v45 = vpop.f32.mrf.mxu3 }
  0x90   :  { %v131_v46 = vadd.f32 %v130_v36, %v81_v44 }
  0x92   :  { %v167_v49 = vadd.f32 %v166_v43, %v131_v46 }
  0x94   :  { %v134_v39 = vpop.f32.mrf.mxu1  ;;  %v206_v52 = vadd.f32 %v205_v45, %v167_v49  ;;  %v372_v45 = vld [vmem:[%s2162_s3 + $0x48] sm:$0xff] }
  0x95   :  { %v88_v38 = vpop.f32.mrf.mxu0  ;;  %v171_v51 = vpop.f32.mrf.mxu2  ;;  %v1801_v46 = vand.u32 4294901760, %v372_v45 }
  0x96   :  { %v89_v50 = vadd.f32 %v1636_v40, %v88_v38 }
  0x97   :  { %v211_v54 = vpop.f32.mrf.mxu3  ;;  %399 = vmatpush.msrb.mxu2 %v1801_v46  ;;  %614 = vmatpush.msra.mxu1 %v1801_v46 }
  0x98   :  { %v135_v53 = vadd.f32 %v134_v39, %v89_v50  ;;  %v370_v50 = vld [vmem:[%s2162_s3 + $0x38] sm:$0xff] }
  0x9a   :  { %v172_v59 = vadd.f32 %v171_v51, %v135_v53  ;;  %v1822_v53 = vand.u32 4294901760, %v370_v50 }
  0x9c   :  { %v138_v42 = vpop.f32.mrf.mxu1  ;;  %v212_v0 = vadd.f32 %v211_v54, %v172_v59  ;;  %v369_v54 = vld [vmem:[%s2162_s3 + $0x30] sm:$0xff]  ;;  %v368_v59 = vld [vmem:[%s2162_s3 + $0x28] sm:$0xff] }
  0x9d   :  { %v96_v41 = vpop.f32.mrf.mxu0  ;;  %v176_v61 = vpop.f32.mrf.mxu2 }
  0x9e   :  { %v97_v58 = vadd.f32 %v1636_v40, %v96_v41 }
  0x9f   :  { %v217_v9 = vpop.f32.mrf.mxu3 }
  0xa0   :  { %v139_v63 = vadd.f32 %v138_v42, %v97_v58  ;;  %v1837_v58 = vand.u32 4294901760, %v369_v54 }
  0xa2   :  { %v177_v8 = vadd.f32 %v176_v61, %v139_v63  ;;  %v1848_v63 = vsub.f32 %v369_v54, %v1837_v58 }
  0xa4   :  { %v142_v48 = vpop.f32.mrf.mxu1  ;;  %v218_v17 = vadd.f32 %v217_v9, %v177_v8  ;;  %v487_v4 = vand.u32 4294901760, %v1848_v63  ;;  %v366_v9 = vld [vmem:[%s2162_s3 + $0x18] sm:$0xff] }
  0xa5   :  { %v104_v47 = vpop.f32.mrf.mxu0  ;;  %v181_v20 = vpop.f32.mrf.mxu2 }
  0xa6   :  { %v105_v10 = vadd.f32 %v1636_v40, %v104_v47  ;;  %v371_v47 = vld [vmem:[%s2162_s3 + $0x40] sm:$0xff] }
  0xa7   :  { %v223_v30 = vpop.f32.mrf.mxu3  ;;  %v1810_v49 = vand.u32 4294901760, %v371_v47 }
  0xa8   :  { %v143_v19 = vadd.f32 %v142_v48, %v105_v10  ;;  %v1807_v48 = vsub.f32 %v372_v45, %v1801_v46 }
  0xa9   :  { %401 = vmatpush.msrb.mxu2 %v1810_v49  ;;  %616 = vmatpush.msra.mxu1 %v1810_v49 }
  0xaa   :  { %v182_v28 = vadd.f32 %v181_v20, %v143_v19  ;;  %v469_v51 = vand.u32 4294901760, %v1807_v48  ;;  %556 = vmatpush.msra.mxu0 %v1807_v48  ;;  %v365_v19 = vld [vmem:[%s2162_s3 + $0x10] sm:$0xff] }
  0xab   :  { %403 = vmatpush.msrb.mxu2 %v1822_v53  ;;  %618 = vmatpush.msra.mxu1 %v1822_v53 }
  0xac   :  { %v281_v56 = vpop.f32.mrf.mxu1  ;;  %v224_v34 = vadd.f32 %v223_v30, %v182_v28 }
  0xad   :  { %v247_v55 = vpop.f32.mrf.mxu0  ;;  %405 = vmatpush.msrb.mxu2 %v1837_v58  ;;  %620 = vmatpush.msra.mxu1 %v1837_v58 }
  0xae   :  { %v248_v57 = vadd.f32 %v247_v55, %v206_v52  ;;  %v1818_v52 = vsub.f32 %v371_v47, %v1810_v49  ;;  %v470_v55 = vsub.f32 %v1807_v48, %v469_v51 }
  0xb0   :  { %v282_v60 = vadd.f32 %v281_v56, %v248_v57  ;;  %v475_v56 = vand.u32 4294901760, %v1818_v52  ;;  %v1833_v57 = vsub.f32 %v370_v50, %v1822_v53  ;;  %559 = vmatpush.msra.mxu0 %v1818_v52 }
  0xb2   :  { %v296_v62 = vmax.f32 %v282_v60, 0.0  ;;  %v471_v60 = vand.u32 4294901760, %v470_v55  ;;  %v476_v61 = vsub.f32 %v1818_v52, %v475_v56  ;;  %562 = vmatpush.msra.mxu0 %v1833_v57 }
  0xb4   :  { %306 = vst.msk [vmem:[#allocation2 + $0x2] sm:$0xff] %vm305_vm2, %v296_v62  ;;  %v285_v2 = vpop.f32.mrf.mxu1  ;;  %v481_v62 = vand.u32 4294901760, %v1833_v57  ;;  %472 = vmatpush.msrb.mxu3 %v471_v60  ;;  %565 = vmatpush.msra.mxu0 %v1848_v63 }
  0xb5   :  { %v251_v1 = vpop.f32.mrf.mxu0 }
  0xb6   :  { %v252_v5 = vadd.f32 %v251_v1, %v212_v0  ;;  %v1852_v0 = vand.u32 4294901760, %v368_v59  ;;  %v367_v1 = vld [vmem:[%s2162_s3 + $0x20] sm:$0xff]  ;;  %v482_v3 = vsub.f32 %v1833_v57, %v481_v62 }
  0xb8   :  { %v286_v11 = vadd.f32 %v285_v2, %v252_v5  ;;  %v477_v2 = vand.u32 4294901760, %v476_v61  ;;  %v1863_v5 = vand.u32 4294901760, %v367_v1  ;;  %v1866_v8 = vsub.f32 %v368_v59, %v1852_v0  ;;  %407 = vmatpush.msrb.mxu2 %v1852_v0  ;;  %622 = vmatpush.msra.mxu1 %v1852_v0 }
  0xb9   :  { %v483_v10 = vand.u32 4294901760, %v482_v3 }
  0xba   :  { %v297_v14 = vmax.f32 %v286_v11, 0.0  ;;  %478 = vmatpush.msrb.mxu3 %v477_v2  ;;  %v488_v11 = vsub.f32 %v1848_v63, %v487_v4  ;;  %568 = vmatpush.msra.mxu0 %v1866_v8 }
  0xbb   :  { %v314_v18 = vld [vmem:[#allocation2 + $0x2] sm:$0xff]  ;;  %409 = vmatpush.msrb.mxu2 %v1863_v5  ;;  %624 = vmatpush.msra.mxu1 %v1863_v5 }
  0xbc   :  { %307 = vst.msk [vmem:[#allocation2 + $0xa] sm:$0xff] %vm305_vm2, %v297_v14  ;;  %326 = vrot.lane.b32.xlu0 %v314_v18, %s1677_s23  ;;  %v289_v24 = vpop.f32.mrf.mxu1  ;;  %v1877_v14 = vsub.f32 %v367_v1, %v1863_v5  ;;  %v493_v18 = vand.u32 4294901760, %v1866_v8  ;;  %484 = vmatpush.msrb.mxu3 %v483_v10  ;;  %v489_v20 = vand.u32 4294901760, %v488_v11  ;;  %v310_v12 = vld [vmem:[#allocation2 + $0x1] sm:$0xff] }
  0xbd   :  { %v255_v23 = vpop.f32.mrf.mxu0 }
  0xbe   :  { %v256_v25 = vadd.f32 %v255_v23, %v218_v17  ;;  %v1879_v17 = vand.u32 4294901760, %v366_v9  ;;  %v499_v21 = vand.u32 4294901760, %v1877_v14  ;;  %v1889_v23 = vand.u32 4294901760, %v365_v19  ;;  %571 = vmatpush.msra.mxu0 %v1877_v14  ;;  %490 = vmatpush.msrb.mxu3 %v489_v20 }
  0xc0   :  { %v290_v29 = vadd.f32 %v289_v24, %v256_v25  ;;  %v504_v22 = vsub.f32 %v366_v9, %v1879_v17  ;;  %v494_v24 = vsub.f32 %v1866_v8, %v493_v18  ;;  %v364_v25 = vld [vmem:[%s2162_s3 + $0x8] sm:$0xff]  ;;  %411 = vmatpush.msrb.mxu2 %v1879_v17  ;;  %v500_v26 = vsub.f32 %v1877_v14, %v499_v21 }
  0xc1   :  { %v510_v28 = vsub.f32 %v365_v19, %v1889_v23  ;;  %626 = vmatpush.msra.mxu1 %v1879_v17 }
  0xc2   :  { %v298_v31 = vmax.f32 %v290_v29, 0.0  ;;  %v505_v27 = vand.u32 4294901760, %v504_v22  ;;  %v414_v29 = vand.u32 4294901760, %v364_v25  ;;  %v495_v30 = vand.u32 4294901760, %v494_v24  ;;  %574 = vmatpush.msra.mxu0 %v504_v22  ;;  %413 = vmatpush.msrb.mxu2 %v1889_v23 }
  0xc3   :  { %v315_v32 = vld [vmem:[#allocation2 + $0xa] sm:$0xff]  ;;  %628 = vmatpush.msra.mxu1 %v1889_v23 }
  0xc4   :  { %v318_v33 = vld [vmem:[#allocation2 + $0x3] sm:$0xff]  ;;  %308 = vst.msk [vmem:[#allocation2 + $0x1a] sm:$0xff] %vm305_vm2, %v298_v31  ;;  %328 = vrot.lane.b32.xlu1 %v315_v32, %s1677_s23  ;;  %v293_v36 = vpop.f32.mrf.mxu1  ;;  %v319_v41 = vld [vmem:[#allocation2 + $0xb] sm:$0xff]  ;;  %v501_v32 = vand.u32 4294901760, %v500_v26  ;;  %496 = vmatpush.msrb.mxu3 %v495_v30 }
  0xc5   :  { %342 = vrot.lane.b32.xlu0 %v318_v33, %s1678_s24  ;;  %v259_v35 = vpop.f32.mrf.mxu0  ;;  %v363_v31 = vld [vmem:[%s2162_s3] sm:$0xff]  ;;  %v506_v33 = vsub.f32 %v504_v22, %v505_v27  ;;  %577 = vmatpush.msra.mxu0 %v510_v28  ;;  %v311_v55 = vld [vmem:[#allocation2 + $0x9] sm:$0xff] }
  0xc6   :  { %v260_v37 = vadd.f32 %v259_v35, %v224_v34  ;;  %v511_v34 = vand.u32 4294901760, %v510_v28  ;;  %v516_v35 = vsub.f32 %v364_v25, %v414_v29  ;;  %630 = vmatpush.msra.mxu1 %v414_v29  ;;  %415 = vmatpush.msrb.mxu2 %v414_v29 }
  0xc7   :  { %502 = vmatpush.msrb.mxu3 %v501_v32  ;;  %v1637_v32 = vld [vmem:[%s2163_s4] ss:$0 sm:$0xff] }
  0xc8   :  { %v294_v38 = vadd.f32 %v293_v36, %v260_v37  ;;  %v416_v36 = vand.u32 4294901760, %v363_v31  ;;  %v507_v37 = vand.u32 4294901760, %v506_v33  ;;  %580 = vmatpush.msra.mxu0 %v516_v35 }
  0xca   :  { %v299_v39 = vmax.f32 %v294_v38, 0.0  ;;  %v512_v38 = vsub.f32 %v510_v28, %v511_v34  ;;  %632 = vmatpush.msra.mxu1 %v416_v36  ;;  %417 = vmatpush.msrb.mxu2 %v416_v36 }
  0xcb   :  { %v316_v40 = vld [vmem:[#allocation2 + $0x1a] sm:$0xff]  ;;  %508 = vmatpush.msrb.mxu3 %v507_v37 }
  0xcc   :  { %309 = vst.msk [vmem:[#allocation2 + $0x22] sm:$0xff] %vm305_vm2, %v299_v39  ;;  %330 = vrot.lane.b32.xlu2 %v316_v40, %s1677_s23  ;;  %344 = vrot.lane.b32.xlu1 %v319_v41, %s1678_s24  ;;  %v517_v39 = vand.u32 4294901760, %v516_v35  ;;  %v522_v40 = vsub.f32 %v363_v31, %v416_v36  ;;  %v513_v41 = vand.u32 4294901760, %v512_v38  ;;  %v312_v50 = vld [vmem:[#allocation2 + $0x19] sm:$0xff] }
  0xcd   :  { %665 = vmatpush.msra.mxu2 %v457_v15 }
  0xce   :  { %583 = vmatpush.msra.mxu0 %v522_v40  ;;  %514 = vmatpush.msrb.mxu3 %v513_v41 }
  0xcf   :  { %669 = vmatpush.msra.mxu2 %v463_v16 }
  0xd1   :  { %673 = vmatpush.msra.mxu2 %v469_v51 }
  0xd3   :  { %v320_v42 = vld [vmem:[#allocation2 + $0x1b] sm:$0xff]  ;;  %v321_v43 = vld [vmem:[#allocation2 + $0x23] sm:$0xff]  ;;  %677 = vmatpush.msra.mxu2 %v475_v56 }
  0xd4   :  { %v317_v44 = vld [vmem:[#allocation2 + $0x22] sm:$0xff]  ;;  %346 = vrot.lane.b32.xlu2 %v320_v42, %s1678_s24  ;;  %348 = vrot.lane.b32.xlu1 %v321_v43, %s1678_s24  ;;  %v518_v42 = vsub.f32 %v516_v35, %v517_v39  ;;  %v523_v43 = vand.u32 4294901760, %v522_v40 }
  0xd5   :  { %332 = vrot.lane.b32.xlu0 %v317_v44, %s1677_s23  ;;  %681 = vmatpush.msra.mxu2 %v481_v62  ;;  %v313_v8 = vld [vmem:[#allocation2 + $0x21] sm:$0xff] }
  0xd6   :  { %v519_v44 = vand.u32 4294901760, %v518_v42  ;;  %v524_v45 = vsub.f32 %v522_v40, %v523_v43 }
  0xd7   :  { %685 = vmatpush.msra.mxu2 %v487_v4 }
  0xd8   :  { %520 = vmatpush.msrb.mxu3 %v519_v44  ;;  %v525_v47 = vand.u32 4294901760, %v524_v45 }
  0xd9   :  { %689 = vmatpush.msra.mxu2 %v493_v18 }
  0xda   :  { %526 = vmatpush.msrb.mxu3 %v525_v47 }
  0xdb   :  { %693 = vmatpush.msra.mxu2 %v499_v21 }
  0xdc   :  { %732 = vmatpush.msra.mxu3 %v1763_v6 }
  0xdd   :  { %697 = vmatpush.msra.mxu2 %v505_v27 }
  0xde   :  { %734 = vmatpush.msra.mxu3 %v1765_v7 }
  0xdf   :  { %701 = vmatpush.msra.mxu2 %v511_v34 }
  0xe0   :  { %736 = vmatpush.msra.mxu3 %v1801_v46 }
  0xe1   :  { %705 = vmatpush.msra.mxu2 %v517_v39 }
  0xe2   :  { %738 = vmatpush.msra.mxu3 %v1810_v49 }
  0xe3   :  { %709 = vmatpush.msra.mxu2 %v523_v43 }
  0xe4   :  { %740 = vmatpush.msra.mxu3 %v1822_v53 }
  0xe6   :  { %742 = vmatpush.msra.mxu3 %v1837_v58 }
  0xe8   :  { %744 = vmatpush.msra.mxu3 %v1852_v0 }
  0xea   :  { %746 = vmatpush.msra.mxu3 %v1863_v5 }
  0xec   :  { %748 = vmatpush.msra.mxu3 %v1879_v17 }
  0xee   :  { %750 = vmatpush.msra.mxu3 %v1889_v23 }
  0xf0   :  { %752 = vmatpush.msra.mxu3 %v414_v29 }
  0xf2   :  { %754 = vmatpush.msra.mxu3 %v416_v36 }
 0x126   :  { %v331_v6 = vpop.permute.xlu2 %330 }
 0x127   :  { %v356_v52 = vsel %vm305_vm2, %v312_v50, %v331_v6 }
 0x12e   :  { %v327_v7 = vpop.permute.xlu0 %326  ;;  %v347_v48 = vpop.permute.xlu2 %346 }
 0x12f   :  { %v354_v13 = vsel %vm305_vm2, %v310_v12, %v327_v7  ;;  %v361_v53 = vsel %vm358_vm3, %v356_v52, %v347_v48 }
 0x130   :  { %v385_v57 = vsel %vm377_vm4, %v361_v53, 0 }
 0x131   :  { %v434_v63 = vand.u32 4294901760, %v385_v57 }
 0x133   :  { %v435_v3 = vsub.f32 %v385_v57, %v434_v63 }
 0x135   :  { %v436_v18 = vand.u32 4294901760, %v435_v3 }
 0x136   :  { %v329_v15 = vpop.permute.xlu1 %328 }
 0x137   :  { %v343_v16 = vpop.permute.xlu0 %342  ;;  %v355_v58 = vsel %vm305_vm2, %v311_v55, %v329_v15  ;;  %v437_v21 = vsub.f32 %v435_v3, %v436_v18 }
 0x138   :  { %v359_v46 = vsel %vm358_vm3, %v354_v13, %v343_v16 }
 0x139   :  { %v379_v49 = vsel %vm377_vm4, %v359_v46, 0  ;;  %v438_v23 = vand.u32 4294901760, %v437_v21 }
 0x13a   :  { %v418_v51 = vand.u32 4294901760, %v379_v49 }
 0x13c   :  { %v419_v54 = vsub.f32 %v379_v49, %v418_v51  ;;  %528 = vmatmul.f32.vlgmr.msrb.gmra.mxu3 %v418_v51 }
 0x13e   :  { %586 = vmatmul.f32.vlgmr.msra.gmra.mxu0 %v419_v54  ;;  %v420_v56 = vand.u32 4294901760, %v419_v54  ;;  %v345_v59 = vpop.permute.xlu1 %344 }
 0x13f   :  { %v360_v60 = vsel %vm358_vm3, %v355_v58, %v345_v59 }
 0x140   :  { %636 = vmatmul.f32.vlgmr.msra.gmra.mxu1 %v420_v56  ;;  %v421_v61 = vsub.f32 %v419_v54, %v420_v56  ;;  %v382_v62 = vsel %vm377_vm4, %v360_v60, 0 }
 0x141   :  { %v426_v0 = vand.u32 4294901760, %v382_v62 }
 0x142   :  { %v422_v1 = vand.u32 4294901760, %v421_v61 }
 0x143   :  { %v427_v2 = vsub.f32 %v382_v62, %v426_v0 }
 0x144   :  { %423 = vmatmul.f32.vlgmr.msrb.gmra.mxu2 %v422_v1  ;;  %532 = vmatmul.f32.gmra.mxu3 %v426_v0 }
 0x145   :  { %v428_v4 = vand.u32 4294901760, %v427_v2 }
 0x146   :  { %591 = vmatmul.f32.gmra.mxu0 %v427_v2  ;;  %v349_v5 = vpop.permute.xlu1 %348 }
 0x147   :  { %v333_v9 = vpop.permute.xlu0 %332  ;;  %v429_v10 = vsub.f32 %v427_v2, %v428_v4 }
 0x148   :  { %642 = vmatmul.f32.gmra.mxu1 %v428_v4  ;;  %v357_v11 = vsel %vm305_vm2, %v313_v8, %v333_v9 }
 0x149   :  { %v362_v14 = vsel %vm358_vm3, %v357_v11, %v349_v5  ;;  %v430_v17 = vand.u32 4294901760, %v429_v10 }
 0x14a   :  { %v388_v19 = vsel %vm377_vm4, %v362_v14, 0 }
 0x14b   :  { %v442_v20 = vand.u32 4294901760, %v388_v19 }
 0x14c   :  { %431 = vmatmul.f32.gmra.mxu2 %v430_v17  ;;  %536 = vmatmul.f32.gmra.mxu3 %v434_v63 }
 0x14d   :  { %v443_v22 = vsub.f32 %v388_v19, %v442_v20 }
 0x14e   :  { %596 = vmatmul.f32.gmra.mxu0 %v435_v3 }
 0x14f   :  { %v444_v24 = vand.u32 4294901760, %v443_v22 }
 0x150   :  { %648 = vmatmul.f32.gmra.mxu1 %v436_v18 }
 0x151   :  { %v445_v25 = vsub.f32 %v443_v22, %v444_v24 }
 0x153   :  { %v446_v26 = vand.u32 4294901760, %v445_v25 }
 0x154   :  { %439 = vmatmul.f32.gmra.mxu2 %v438_v23  ;;  %540 = vmatmul.f32.gmra.mxu3 %v442_v20 }
 0x156   :  { %601 = vmatmul.f32.gmra.mxu0 %v443_v22 }
 0x158   :  { %654 = vmatmul.f32.gmra.mxu1 %v444_v24  ;;  %v1628_v24 = vld [vmem:[%s2162_s3 + $0xb8] sm:$0xff] }
 0x159   :  { %v1958_v25 = vand.u32 4294901760, %v1628_v24 }
 0x15b   :  { %864 = vmatpush.msrb.mxu0 %v1958_v25  ;;  %1079 = vmatpush.msrb.mxu3 %v1958_v25 }
 0x15c   :  { %447 = vmatmul.f32.gmra.mxu2 %v446_v26  ;;  %756 = vmatmul.f32.vlgmr.msra.gmra.mxu3 %v418_v51  ;;  %v1627_v26 = vld [vmem:[%s2162_s3 + $0xb0] sm:$0xff] }
 0x164   :  { %711 = vmatmul.f32.vlgmr.msra.gmra.mxu2 %v418_v51  ;;  %760 = vmatmul.f32.gmra.mxu3 %v426_v0 }
 0x16c   :  { %715 = vmatmul.f32.gmra.mxu2 %v426_v0  ;;  %764 = vmatmul.f32.gmra.mxu3 %v434_v63 }
 0x174   :  { %719 = vmatmul.f32.gmra.mxu2 %v434_v63  ;;  %768 = vmatmul.f32.gmra.mxu3 %v442_v20 }
 0x17c   :  { %723 = vmatmul.f32.gmra.mxu2 %v442_v20 }
 0x1bb   :  { %v587_v36 = vpop.f32.mrf.mxu0 }
 0x1bd   :  { %v637_v38 = vpop.f32.mrf.mxu1 }
 0x1bf   :  { %v529_v27 = vpop.f32.mrf.mxu3 }
 0x1c3   :  { %v592_v43 = vpop.f32.mrf.mxu0 }
 0x1c5   :  { %v643_v7 = vpop.f32.mrf.mxu1 }
 0x1c7   :  { %v424_v28 = vpop.f32.mrf.mxu2  ;;  %v533_v29 = vpop.f32.mrf.mxu3 }
 0x1c8   :  { %v425_v35 = vadd.f32 %v1637_v32, %v424_v28  ;;  %v1967_v28 = vand.u32 4294901760, %v1627_v26 }
 0x1ca   :  { %v530_v37 = vadd.f32 %v529_v27, %v425_v35  ;;  %v1965_v27 = vsub.f32 %v1628_v24, %v1958_v25  ;;  %866 = vmatpush.msrb.mxu0 %v1967_v28  ;;  %v1623_v35 = vld [vmem:[%s2162_s3 + $0x90] sm:$0xff]  ;;  %1081 = vmatpush.msrb.mxu3 %v1967_v28 }
 0x1cb   :  { %v597_v50 = vpop.f32.mrf.mxu0 }
 0x1cc   :  { %v588_v41 = vadd.f32 %v587_v36, %v530_v37  ;;  %1019 = vmatpush.msrb.mxu2 %v1965_v27 }
 0x1cd   :  { %v649_v56 = vpop.f32.mrf.mxu1 }
 0x1ce   :  { %v638_v45 = vadd.f32 %v637_v38, %v588_v41  ;;  %v1995_v38 = vand.u32 4294901760, %v1623_v35 }
 0x1cf   :  { %v432_v30 = vpop.f32.mrf.mxu2  ;;  %v537_v31 = vpop.f32.mrf.mxu3 }
 0x1d0   :  { %v433_v40 = vadd.f32 %v1637_v32, %v432_v30  ;;  %v926_v30 = vand.u32 4294901760, %v1965_v27 }
 0x1d2   :  { %v534_v44 = vadd.f32 %v533_v29, %v433_v40  ;;  %v1626_v29 = vld [vmem:[%s2162_s3 + $0xa8] sm:$0xff] }
 0x1d3   :  { %v602_v0 = vpop.f32.mrf.mxu0 }
 0x1d4   :  { %v593_v15 = vadd.f32 %v592_v43, %v534_v44  ;;  %v2014_v44 = vsub.f32 %v1623_v35, %v1995_v38 }
 0x1d5   :  { %v655_v4 = vpop.f32.mrf.mxu1 }
 0x1d6   :  { %v644_v49 = vadd.f32 %v643_v7, %v593_v15 }
 0x1d7   :  { %v440_v33 = vpop.f32.mrf.mxu2  ;;  %v541_v34 = vpop.f32.mrf.mxu3 }
 0x1d8   :  { %v441_v12 = vadd.f32 %v1637_v32, %v440_v33  ;;  %v1625_v33 = vld [vmem:[%s2162_s3 + $0xa0] sm:$0xff] }
 0x1d9   :  { %v1990_v36 = vand.u32 4294901760, %v1625_v33 }
 0x1da   :  { %v538_v48 = vadd.f32 %v537_v31, %v441_v12  ;;  %v1976_v31 = vsub.f32 %v1627_v26, %v1967_v28 }
 0x1dc   :  { %v598_v55 = vadd.f32 %v597_v50, %v538_v48  ;;  %v932_v40 = vand.u32 4294901760, %v1976_v31  ;;  %1022 = vmatpush.msrb.mxu2 %v1976_v31 }
 0x1de   :  { %v650_v60 = vadd.f32 %v649_v56, %v598_v55 }
 0x1df   :  { %v448_v39 = vpop.f32.mrf.mxu2  ;;  %v757_v42 = vpop.f32.mrf.mxu3 }
 0x1e0   :  { %v449_v53 = vadd.f32 %v1637_v32, %v448_v39  ;;  %v1979_v32 = vand.u32 4294901760, %v1626_v29  ;;  %v927_v39 = vsub.f32 %v1965_v27, %v926_v30 }
 0x1e2   :  { %v542_v59 = vadd.f32 %v541_v34, %v449_v53  ;;  %v1624_v34 = vld [vmem:[%s2162_s3 + $0x98] sm:$0xff]  ;;  %v2002_v41 = vsub.f32 %v1626_v29, %v1979_v32  ;;  %868 = vmatpush.msrb.mxu0 %v1979_v32  ;;  %1083 = vmatpush.msrb.mxu3 %v1979_v32 }
 0x1e3   :  { %v1993_v37 = vand.u32 4294901760, %v1624_v34 }
 0x1e4   :  { %v603_v2 = vadd.f32 %v602_v0, %v542_v59  ;;  %1025 = vmatpush.msrb.mxu2 %v2002_v41  ;;  %870 = vmatpush.msrb.mxu0 %v1990_v36 }
 0x1e5   :  { %v2010_v43 = vsub.f32 %v1624_v34, %v1993_v37  ;;  %1085 = vmatpush.msrb.mxu3 %v1990_v36 }
 0x1e6   :  { %v656_v10 = vadd.f32 %v655_v4, %v603_v2  ;;  %872 = vmatpush.msrb.mxu0 %v1993_v37  ;;  %v1618_v4 = vld [vmem:[%s2162_s3 + $0x68] sm:$0xff] }
 0x1e7   :  { %v712_v47 = vpop.f32.mrf.mxu2  ;;  %v761_v46 = vpop.f32.mrf.mxu3  ;;  %v950_v12 = vand.u32 4294901760, %v2010_v43  ;;  %1087 = vmatpush.msrb.mxu3 %v1993_v37 }
 0x1e8   :  { %v713_v6 = vadd.f32 %v712_v47, %v638_v45  ;;  %v928_v45 = vand.u32 4294901760, %v927_v39  ;;  %v933_v47 = vsub.f32 %v1976_v31, %v932_v40  ;;  %874 = vmatpush.msrb.mxu0 %v1995_v38 }
 0x1e9   :  { %v951_v48 = vsub.f32 %v2010_v43, %v950_v12  ;;  %1089 = vmatpush.msrb.mxu3 %v1995_v38 }
 0x1ea   :  { %v758_v13 = vadd.f32 %v757_v42, %v713_v6  ;;  %v2007_v42 = vsub.f32 %v1625_v33, %v1990_v36  ;;  %v938_v6 = vand.u32 4294901760, %v2002_v41  ;;  %929 = vmatpush.msrb.mxu1 %v928_v45  ;;  %v934_v15 = vand.u32 4294901760, %v933_v47 }
 0x1eb   :  { %v952_v55 = vand.u32 4294901760, %v951_v48 }
 0x1ec   :  { %v772_v16 = vmax.f32 %v758_v13, 0.0  ;;  %v944_v7 = vand.u32 4294901760, %v2007_v42  ;;  %v956_v13 = vand.u32 4294901760, %v2014_v44  ;;  %1028 = vmatpush.msrb.mxu2 %v2007_v42  ;;  %935 = vmatpush.msrb.mxu1 %v934_v15 }
 0x1ee   :  { %776 = vst.msk [vmem:[#allocation2 + $0x2] sm:$0xff] %vm305_vm2, %v772_v16  ;;  %v939_v16 = vsub.f32 %v2002_v41, %v938_v6  ;;  %1031 = vmatpush.msrb.mxu2 %v2010_v43 }
 0x1ef   :  { %v716_v51 = vpop.f32.mrf.mxu2  ;;  %v765_v61 = vpop.f32.mrf.mxu3 }
 0x1f0   :  { %v717_v52 = vadd.f32 %v716_v51, %v644_v49  ;;  %v1622_v49 = vld [vmem:[%s2162_s3 + $0x88] sm:$0xff]  ;;  %v940_v50 = vand.u32 4294901760, %v939_v16  ;;  %v957_v51 = vsub.f32 %v2014_v44, %v956_v13  ;;  %1034 = vmatpush.msrb.mxu2 %v2014_v44 }
 0x1f2   :  { %v762_v54 = vadd.f32 %v761_v46, %v717_v52  ;;  %v945_v46 = vsub.f32 %v2007_v42, %v944_v7  ;;  %v2045_v52 = vand.u32 4294901760, %v1622_v49  ;;  %941 = vmatpush.msrb.mxu1 %v940_v50  ;;  %v958_v59 = vand.u32 4294901760, %v957_v51 }
 0x1f4   :  { %v773_v57 = vmax.f32 %v762_v54, 0.0  ;;  %v946_v53 = vand.u32 4294901760, %v945_v46  ;;  %v1621_v54 = vld [vmem:[%s2162_s3 + $0x80] sm:$0xff]  ;;  %v2053_v56 = vsub.f32 %v1622_v49, %v2045_v52  ;;  %876 = vmatpush.msrb.mxu0 %v2045_v52  ;;  %1091 = vmatpush.msrb.mxu3 %v2045_v52 }
 0x1f5   :  { %v784_v58 = vld [vmem:[#allocation2 + $0x2] sm:$0xff] }
 0x1f6   :  { %777 = vst.msk [vmem:[#allocation2 + $0xa] sm:$0xff] %vm305_vm2, %v773_v57  ;;  %796 = vrot.lane.b32.xlu2 %v784_v58, %s1677_s23  ;;  %v2056_v57 = vand.u32 4294901760, %v1621_v54  ;;  %v1620_v58 = vld [vmem:[%s2162_s3 + $0x78] sm:$0xff]  ;;  %947 = vmatpush.msrb.mxu1 %v946_v53  ;;  %v780_v27 = vld [vmem:[#allocation2] sm:$0xff] }
 0x1f7   :  { %v720_v62 = vpop.f32.mrf.mxu2  ;;  %v769_v17 = vpop.f32.mrf.mxu3  ;;  %1037 = vmatpush.msrb.mxu2 %v2053_v56 }
 0x1f8   :  { %v721_v63 = vadd.f32 %v720_v62, %v650_v60  ;;  %v962_v60 = vand.u32 4294901760, %v2053_v56  ;;  %v2068_v62 = vand.u32 4294901760, %v1620_v58  ;;  %878 = vmatpush.msrb.mxu0 %v2056_v57  ;;  %1093 = vmatpush.msrb.mxu3 %v2056_v57 }
 0x1f9   :  { %953 = vmatpush.msrb.mxu1 %v952_v55 }
 0x1fa   :  { %v766_v1 = vadd.f32 %v765_v61, %v721_v63  ;;  %v2065_v61 = vsub.f32 %v1621_v54, %v2056_v57  ;;  %v1619_v63 = vld [vmem:[%s2162_s3 + $0x70] sm:$0xff]  ;;  %v963_v0 = vsub.f32 %v2053_v56, %v962_v60  ;;  %v973_v2 = vsub.f32 %v1620_v58, %v2068_v62  ;;  %1095 = vmatpush.msrb.mxu3 %v2068_v62 }
 0x1fb   :  { %880 = vmatpush.msrb.mxu0 %v2068_v62  ;;  %959 = vmatpush.msrb.mxu1 %v958_v59 }
 0x1fc   :  { %v774_v3 = vmax.f32 %v766_v1, 0.0  ;;  %v968_v1 = vand.u32 4294901760, %v2065_v61  ;;  %1040 = vmatpush.msrb.mxu2 %v2065_v61 }
 0x1fd   :  { %v785_v5 = vld [vmem:[#allocation2 + $0xa] sm:$0xff] }
 0x1fe   :  { %v788_v8 = vld [vmem:[#allocation2 + $0x4] sm:$0xff]  ;;  %v789_v9 = vld [vmem:[#allocation2 + $0xc] sm:$0xff]  ;;  %778 = vst.msk [vmem:[#allocation2 + $0x1a] sm:$0xff] %vm305_vm2, %v774_v3  ;;  %798 = vrot.lane.b32.xlu1 %v785_v5, %s1677_s23  ;;  %v2079_v3 = vand.u32 4294901760, %v1619_v63  ;;  %v964_v5 = vand.u32 4294901760, %v963_v0  ;;  %1043 = vmatpush.msrb.mxu2 %v973_v2 }
 0x1ff   :  { %812 = vrot.lane.b32.xlu0 %v788_v8, %s1678_s24  ;;  %814 = vrot.lane.b32.xlu2 %v789_v9, %s1678_s24  ;;  %v724_v11 = vpop.f32.mrf.mxu2  ;;  %v969_v8 = vsub.f32 %v2065_v61, %v968_v1  ;;  %v974_v9 = vand.u32 4294901760, %v973_v2  ;;  %v781_v31 = vld [vmem:[#allocation2 + $0x8] sm:$0xff] }
 0x200   :  { %v725_v14 = vadd.f32 %v724_v11, %v656_v10  ;;  %v979_v10 = vsub.f32 %v1619_v63, %v2079_v3  ;;  %v883_v11 = vand.u32 4294901760, %v1618_v4  ;;  %1097 = vmatpush.msrb.mxu3 %v2079_v3  ;;  %882 = vmatpush.msrb.mxu0 %v2079_v3 }
 0x201   :  { %965 = vmatpush.msrb.mxu1 %v964_v5 }
 0x202   :  { %v770_v18 = vadd.f32 %v769_v17, %v725_v14  ;;  %v1617_v14 = vld [vmem:[%s2162_s3 + $0x60] sm:$0xff]  ;;  %v970_v17 = vand.u32 4294901760, %v969_v8  ;;  %1046 = vmatpush.msrb.mxu2 %v979_v10  ;;  %1099 = vmatpush.msrb.mxu3 %v883_v11  ;;  %v1248_v8 = vld [vmem:[%s2164_s5 + $0x18] sm:$0xff] }
 0x203   :  { %884 = vmatpush.msrb.mxu0 %v883_v11 }
 0x204   :  { %v775_v19 = vmax.f32 %v770_v18, 0.0  ;;  %v975_v18 = vsub.f32 %v973_v2, %v974_v9  ;;  %971 = vmatpush.msrb.mxu1 %v970_v17 }
 0x205   :  { %v786_v20 = vld [vmem:[#allocation2 + $0x1a] sm:$0xff] }
 0x206   :  { %779 = vst.msk [vmem:[#allocation2 + $0x22] sm:$0xff] %vm305_vm2, %v775_v19  ;;  %v980_v19 = vand.u32 4294901760, %v979_v10  ;;  %v782_v49 = vld [vmem:[#allocation2 + $0x18] sm:$0xff] }
 0x207   :  { %800 = vrot.lane.b32.xlu0 %v786_v20, %s1677_s23  ;;  %v885_v20 = vand.u32 4294901760, %v1617_v14 }
 0x209   :  { %v991_v24 = vsub.f32 %v1617_v14, %v885_v20  ;;  %1101 = vmatpush.msrb.mxu3 %v885_v20  ;;  %886 = vmatpush.msrb.mxu0 %v885_v20  ;;  %v1247_v14 = vld [vmem:[%s2164_s5 + $0x10] sm:$0xff] }
 0x20b   :  { %v992_v33 = vand.u32 4294901760, %v991_v24  ;;  %1134 = vmatpush.msra.mxu0 %v926_v30 }
 0x20d   :  { %v790_v21 = vld [vmem:[#allocation2 + $0x1c] sm:$0xff]  ;;  %v791_v22 = vld [vmem:[#allocation2 + $0x24] sm:$0xff]  ;;  %v993_v35 = vsub.f32 %v991_v24, %v992_v33  ;;  %1138 = vmatpush.msra.mxu0 %v932_v40 }
 0x20e   :  { %v787_v23 = vld [vmem:[#allocation2 + $0x22] sm:$0xff]  ;;  %816 = vrot.lane.b32.xlu1 %v790_v21, %s1678_s24  ;;  %v985_v21 = vsub.f32 %v1618_v4, %v883_v11 }
 0x20f   :  { %818 = vrot.lane.b32.xlu0 %v791_v22, %s1678_s24  ;;  %802 = vrot.lane.b32.xlu2 %v787_v23, %s1677_s23  ;;  %v976_v22 = vand.u32 4294901760, %v975_v18  ;;  %v981_v23 = vsub.f32 %v979_v10, %v980_v19  ;;  %v994_v45 = vand.u32 4294901760, %v993_v35  ;;  %v783_v48 = vld [vmem:[#allocation2 + $0x20] sm:$0xff]  ;;  %v1277_v10 = vand.u32 4294901760, %v1248_v8 }
 0x210   :  { %v986_v26 = vand.u32 4294901760, %v985_v21  ;;  %1049 = vmatpush.msrb.mxu2 %v985_v21  ;;  %1142 = vmatpush.msra.mxu0 %v938_v6  ;;  %v1279_v18 = vand.u32 4294901760, %v1247_v14 }
 0x211   :  { %977 = vmatpush.msrb.mxu1 %v976_v22  ;;  %v982_v29 = vand.u32 4294901760, %v981_v23  ;;  %v1245_v23 = vld [vmem:[%s2164_s5] sm:$0xff] }
 0x212   :  { %v987_v34 = vsub.f32 %v985_v21, %v986_v26  ;;  %1052 = vmatpush.msrb.mxu2 %v991_v24  ;;  %1146 = vmatpush.msra.mxu0 %v944_v7  ;;  %v1337_v21 = vsub.f32 %v1247_v14, %v1279_v18  ;;  %v1283_v35 = vand.u32 4294901760, %v1245_v23 }
 0x213   :  { %983 = vmatpush.msrb.mxu1 %v982_v29 }
 0x214   :  { %v988_v39 = vand.u32 4294901760, %v987_v34  ;;  %1150 = vmatpush.msra.mxu0 %v950_v12  ;;  %1278 = vmatpush.msra.mxu2 %v1277_v10 }
 0x216   :  { %989 = vmatpush.msrb.mxu1 %v988_v39  ;;  %1154 = vmatpush.msra.mxu0 %v956_v13 }
 0x217   :  { %1280 = vmatpush.msra.mxu2 %v1279_v18 }
 0x218   :  { %995 = vmatpush.msrb.mxu1 %v994_v45  ;;  %1158 = vmatpush.msra.mxu0 %v962_v60 }
 0x21a   :  { %1201 = vmatpush.msra.mxu1 %v1958_v25  ;;  %1162 = vmatpush.msra.mxu0 %v968_v1 }
 0x21c   :  { %1203 = vmatpush.msra.mxu1 %v1967_v28  ;;  %1166 = vmatpush.msra.mxu0 %v974_v9 }
 0x21e   :  { %1205 = vmatpush.msra.mxu1 %v1979_v32  ;;  %1170 = vmatpush.msra.mxu0 %v980_v19  ;;  %v1246_v19 = vld [vmem:[%s2164_s5 + $0x8] sm:$0xff] }
 0x21f   :  { %v1281_v22 = vand.u32 4294901760, %v1246_v19 }
 0x220   :  { %1207 = vmatpush.msra.mxu1 %v1990_v36  ;;  %1174 = vmatpush.msra.mxu0 %v986_v26 }
 0x221   :  { %1282 = vmatpush.msra.mxu2 %v1281_v22  ;;  %v1343_v34 = vsub.f32 %v1246_v19, %v1281_v22 }
 0x222   :  { %1209 = vmatpush.msra.mxu1 %v1993_v37  ;;  %1178 = vmatpush.msra.mxu0 %v992_v33  ;;  %v1338_v33 = vand.u32 4294901760, %v1337_v21 }
 0x223   :  { %v1344_v45 = vand.u32 4294901760, %v1343_v34  ;;  %1284 = vmatpush.msra.mxu2 %v1283_v35 }
 0x224   :  { %1211 = vmatpush.msra.mxu1 %v1995_v38  ;;  %v1339_v39 = vsub.f32 %v1337_v21, %v1338_v33 }
 0x226   :  { %1213 = vmatpush.msra.mxu1 %v2045_v52 }
 0x228   :  { %1215 = vmatpush.msra.mxu1 %v2056_v57 }
 0x22a   :  { %1217 = vmatpush.msra.mxu1 %v2068_v62 }
 0x22c   :  { %1219 = vmatpush.msra.mxu1 %v2079_v3 }
 0x22e   :  { %1221 = vmatpush.msra.mxu1 %v883_v11  ;;  %v1331_v11 = vsub.f32 %v1248_v8, %v1277_v10 }
 0x230   :  { %1223 = vmatpush.msra.mxu1 %v885_v20  ;;  %v1332_v17 = vand.u32 4294901760, %v1331_v11 }
 0x232   :  { %v1333_v20 = vsub.f32 %v1331_v11, %v1332_v17 }
 0x234   :  { %v1334_v29 = vand.u32 4294901760, %v1333_v20 }
 0x236   :  { %1335 = vmatpush.msra.mxu3 %v1334_v29 }
 0x250   :  { %v797_v25 = vpop.permute.xlu2 %796 }
 0x251   :  { %v824_v28 = vsel %vm305_vm2, %v780_v27, %v797_v25  ;;  %v1349_v25 = vsub.f32 %v1245_v23, %v1283_v35  ;;  %v1340_v27 = vand.u32 4294901760, %v1339_v39 }
 0x253   :  { %1341 = vmatpush.msra.mxu3 %v1340_v27 }
 0x259   :  { %v815_v36 = vpop.permute.xlu2 %814 }
 0x269   :  { %v803_v46 = vpop.permute.xlu2 %802 }
 0x26a   :  { %v827_v51 = vsel %vm305_vm2, %v783_v48, %v803_v46 }
 0x270   :  { %v799_v30 = vpop.permute.xlu1 %798 }
 0x271   :  { %v813_v32 = vpop.permute.xlu0 %812  ;;  %v825_v37 = vsel %vm305_vm2, %v781_v31, %v799_v30  ;;  %v1350_v30 = vand.u32 4294901760, %v1349_v25 }
 0x272   :  { %v828_v38 = vsel %vm358_vm3, %v824_v28, %v813_v32  ;;  %v829_v40 = vsel %vm358_vm3, %v825_v37, %v815_v36  ;;  %v1345_v28 = vsub.f32 %v1343_v34, %v1344_v45 }
 0x273   :  { %v848_v41 = vsel %vm377_vm4, %v828_v38, 0  ;;  %v851_v42 = vsel %vm377_vm4, %v829_v40, 0  ;;  %v1351_v32 = vsub.f32 %v1349_v25, %v1350_v30  ;;  %v1638_v40 = vld [vmem:[%s2163_s4 + $0x1] ss:$0 sm:$0xff] }
 0x274   :  { %v887_v43 = vand.u32 4294901760, %v848_v41  ;;  %v895_v44 = vand.u32 4294901760, %v851_v42  ;;  %v1346_v31 = vand.u32 4294901760, %v1345_v28 }
 0x275   :  { %v1352_v38 = vand.u32 4294901760, %v1351_v32 }
 0x276   :  { %v888_v47 = vsub.f32 %v848_v41, %v887_v43  ;;  %997 = vmatmul.f32.vlgmr.msrb.gmra.mxu1 %v887_v43  ;;  %v896_v7 = vsub.f32 %v851_v42, %v895_v44  ;;  %1347 = vmatpush.msra.mxu3 %v1346_v31 }
 0x277   :  { %1429 = vmatpush.msrb.mxu1 %v1277_v10 }
 0x278   :  { %1055 = vmatmul.f32.vlgmr.msrb.gmra.mxu2 %v888_v47  ;;  %v889_v6 = vand.u32 4294901760, %v888_v47  ;;  %v897_v16 = vand.u32 4294901760, %v896_v7  ;;  %1353 = vmatpush.msra.mxu3 %v1352_v38 }
 0x279   :  { %v801_v12 = vpop.permute.xlu0 %800  ;;  %1431 = vmatpush.msrb.mxu1 %v1279_v18  ;;  %1476 = vmatpush.msrb.mxu2 %v1332_v17 }
 0x27a   :  { %1105 = vmatmul.f32.vlgmr.msrb.gmra.mxu3 %v889_v6  ;;  %v890_v13 = vsub.f32 %v888_v47, %v889_v6  ;;  %v898_v50 = vsub.f32 %v896_v7, %v897_v16  ;;  %v826_v52 = vsel %vm305_vm2, %v782_v49, %v801_v12 }
 0x27b   :  { %1433 = vmatpush.msrb.mxu1 %v1281_v22  ;;  %1480 = vmatpush.msrb.mxu2 %v1338_v33 }
 0x27c   :  { %v891_v15 = vand.u32 4294901760, %v890_v13  ;;  %v899_v61 = vand.u32 4294901760, %v898_v50  ;;  %1519 = vmatpush.msrb.mxu3 %v1277_v10 }
 0x27d   :  { %1435 = vmatpush.msrb.mxu1 %v1283_v35  ;;  %1484 = vmatpush.msrb.mxu2 %v1344_v45 }
 0x27e   :  { %892 = vmatmul.f32.vlgmr.msrb.gmra.mxu0 %v891_v15  ;;  %1001 = vmatmul.f32.gmra.mxu1 %v895_v44 }
 0x27f   :  { %1385 = vmatpush.msrb.mxu0 %v1331_v11  ;;  %1488 = vmatpush.msrb.mxu2 %v1350_v30 }
 0x280   :  { %1060 = vmatmul.f32.gmra.mxu2 %v896_v7  ;;  %v817_v53 = vpop.permute.xlu1 %816  ;;  %1521 = vmatpush.msrb.mxu3 %v1279_v18 }
 0x281   :  { %v819_v54 = vpop.permute.xlu0 %818  ;;  %v830_v55 = vsel %vm358_vm3, %v826_v52, %v817_v53  ;;  %1388 = vmatpush.msrb.mxu0 %v1337_v21 }
 0x282   :  { %v831_v56 = vsel %vm358_vm3, %v827_v51, %v819_v54  ;;  %1111 = vmatmul.f32.gmra.mxu3 %v897_v16  ;;  %v854_v57 = vsel %vm377_vm4, %v830_v55, 0 }
 0x283   :  { %v857_v58 = vsel %vm377_vm4, %v831_v56, 0  ;;  %v903_v59 = vand.u32 4294901760, %v854_v57  ;;  %1391 = vmatpush.msrb.mxu0 %v1343_v34  ;;  %1523 = vmatpush.msrb.mxu3 %v1281_v22 }
 0x284   :  { %v911_v60 = vand.u32 4294901760, %v857_v58 }
 0x285   :  { %v904_v62 = vsub.f32 %v854_v57, %v903_v59  ;;  %1394 = vmatpush.msrb.mxu0 %v1349_v25  ;;  %1525 = vmatpush.msrb.mxu3 %v1283_v35 }
 0x286   :  { %900 = vmatmul.f32.gmra.mxu0 %v899_v61  ;;  %1005 = vmatmul.f32.gmra.mxu1 %v903_v59  ;;  %v912_v63 = vsub.f32 %v857_v58, %v911_v60 }
 0x287   :  { %v905_v0 = vand.u32 4294901760, %v904_v62 }
 0x288   :  { %1065 = vmatmul.f32.gmra.mxu2 %v904_v62  ;;  %v913_v3 = vand.u32 4294901760, %v912_v63 }
 0x289   :  { %v906_v1 = vsub.f32 %v904_v62, %v905_v0 }
 0x28a   :  { %1117 = vmatmul.f32.gmra.mxu3 %v905_v0  ;;  %v914_v4 = vsub.f32 %v912_v63, %v913_v3 }
 0x28b   :  { %v907_v2 = vand.u32 4294901760, %v906_v1 }
 0x28c   :  { %v915_v5 = vand.u32 4294901760, %v914_v4 }
 0x28e   :  { %908 = vmatmul.f32.gmra.mxu0 %v907_v2  ;;  %1009 = vmatmul.f32.gmra.mxu1 %v911_v60 }
 0x290   :  { %1070 = vmatmul.f32.gmra.mxu2 %v912_v63 }
 0x292   :  { %1123 = vmatmul.f32.gmra.mxu3 %v913_v3 }
 0x296   :  { %916 = vmatmul.f32.gmra.mxu0 %v915_v5  ;;  %1225 = vmatmul.f32.vlgmr.msra.gmra.mxu1 %v887_v43 }
 0x29e   :  { %1180 = vmatmul.f32.vlgmr.msra.gmra.mxu0 %v887_v43  ;;  %1229 = vmatmul.f32.gmra.mxu1 %v895_v44 }
 0x2a6   :  { %1184 = vmatmul.f32.gmra.mxu0 %v895_v44  ;;  %1233 = vmatmul.f32.gmra.mxu1 %v903_v59 }
 0x2ae   :  { %1188 = vmatmul.f32.gmra.mxu0 %v903_v59  ;;  %1237 = vmatmul.f32.gmra.mxu1 %v911_v60 }
 0x2b6   :  { %1192 = vmatmul.f32.gmra.mxu0 %v911_v60 }
 0x2f3   :  { %v998_v9 = vpop.f32.mrf.mxu1 }
 0x2fb   :  { %v893_v24 = vpop.f32.mrf.mxu0  ;;  %v1002_v26 = vpop.f32.mrf.mxu1 }
 0x2fc   :  { %v894_v43 = vadd.f32 %v1638_v40, %v893_v24  ;;  %v1056_v44 = vpop.f32.mrf.mxu2 }
 0x2fd   :  { %v1106_v6 = vpop.f32.mrf.mxu3 }
 0x2fe   :  { %v999_v47 = vadd.f32 %v998_v9, %v894_v43 }
 0x300   :  { %v1057_v12 = vadd.f32 %v1056_v44, %v999_v47 }
 0x302   :  { %v1107_v46 = vadd.f32 %v1106_v6, %v1057_v12 }
 0x303   :  { %v901_v36 = vpop.f32.mrf.mxu0  ;;  %v1006_v37 = vpop.f32.mrf.mxu1 }
 0x304   :  { %v902_v13 = vadd.f32 %v1638_v40, %v901_v36  ;;  %v1061_v16 = vpop.f32.mrf.mxu2 }
 0x305   :  { %v1112_v51 = vpop.f32.mrf.mxu3 }
 0x306   :  { %v1003_v48 = vadd.f32 %v1002_v26, %v902_v13 }
 0x308   :  { %v1062_v52 = vadd.f32 %v1061_v16, %v1003_v48  ;;  %v1639_v48 = vld [vmem:[%s2165_s6] ss:$0 sm:$0xff] }
 0x30a   :  { %v1113_v57 = vadd.f32 %v1112_v51, %v1062_v52 }
 0x30b   :  { %v909_v41 = vpop.f32.mrf.mxu0  ;;  %v1010_v42 = vpop.f32.mrf.mxu1 }
 0x30c   :  { %v910_v53 = vadd.f32 %v1638_v40, %v909_v41  ;;  %v1066_v60 = vpop.f32.mrf.mxu2 }
 0x30d   :  { %v1118_v4 = vpop.f32.mrf.mxu3 }
 0x30e   :  { %v1007_v58 = vadd.f32 %v1006_v37, %v910_v53 }
 0x310   :  { %v1067_v1 = vadd.f32 %v1066_v60, %v1007_v58  ;;  %v1679_v60 = vmov 0  }
 0x311   :  { %1634 = vset.pattern.permute.xlu1 %v1679_v60  ;;  %1635 = vset.pattern.permute.xlu0 %v1679_v60 }
 0x312   :  { %v1119_v10 = vadd.f32 %v1118_v4, %v1067_v1 }
 0x313   :  { %v917_v7 = vpop.f32.mrf.mxu0  ;;  %v1226_v15 = vpop.f32.mrf.mxu1 }
 0x314   :  { %v918_v2 = vadd.f32 %v1638_v40, %v917_v7  ;;  %v1071_v22 = vpop.f32.mrf.mxu2 }
 0x315   :  { %v1124_v34 = vpop.f32.mrf.mxu3 }
 0x316   :  { %v1011_v11 = vadd.f32 %v1010_v42, %v918_v2 }
 0x318   :  { %v1072_v24 = vadd.f32 %v1071_v22, %v1011_v11 }
 0x31a   :  { %v1125_v39 = vadd.f32 %v1124_v34, %v1072_v24 }
 0x31b   :  { %v1181_v49 = vpop.f32.mrf.mxu0  ;;  %v1230_v56 = vpop.f32.mrf.mxu1 }
 0x31c   :  { %v1182_v50 = vadd.f32 %v1181_v49, %v1107_v46 }
 0x31e   :  { %v1227_v54 = vadd.f32 %v1226_v15, %v1182_v50 }
 0x320   :  { %v1241_v55 = vmax.f32 %v1227_v54, 0.0 }
 0x322   :  { %v1254_v59 = vsel %vm305_vm2, %v1241_v55, 0 }
 0x323   :  { %v1285_v61 = vand.u32 4294901760, %v1254_v59  ;;  %v1185_v62 = vpop.f32.mrf.mxu0  ;;  %v1234_v18 = vpop.f32.mrf.mxu1 }
 0x324   :  { %v1186_v63 = vadd.f32 %v1185_v62, %v1113_v57 }
 0x325   :  { %v1286_v0 = vsub.f32 %v1254_v59, %v1285_v61  ;;  %1355 = vmatmul.f32.vlgmr.msra.gmra.mxu3 %v1285_v61 }
 0x326   :  { %v1231_v3 = vadd.f32 %v1230_v56, %v1186_v63 }
 0x327   :  { %1397 = vmatmul.f32.vlgmr.msrb.gmra.mxu0 %v1286_v0  ;;  %v1287_v5 = vand.u32 4294901760, %v1286_v0 }
 0x328   :  { %v1242_v8 = vmax.f32 %v1231_v3, 0.0 }
 0x329   :  { %1439 = vmatmul.f32.vlgmr.msrb.gmra.mxu1 %v1287_v5  ;;  %v1288_v9 = vsub.f32 %v1286_v0, %v1287_v5  ;;  %v1640_v5 = vld [vmem:[%s2166_s7] ss:$0 sm:$0xff]  ;;  %s1680_s7 = smov [#allocation4]  }
 0x32a   :  { %v1257_v14 = vsel %vm305_vm2, %v1242_v8, 0  ;;  %s1606_s10 = sshll.u32 %s1680_s7, 4  ;;  %s1607_s10 = int_to_ptr.vmem [resolvable:$true] %s1606_s10 }
 0x32b   :  { %v1293_v17 = vand.u32 4294901760, %v1257_v14  ;;  %v1189_v19 = vpop.f32.mrf.mxu0  ;;  %v1289_v20 = vand.u32 4294901760, %v1288_v9  ;;  %v1238_v31 = vpop.f32.mrf.mxu1 }
 0x32c   :  { %v1190_v21 = vadd.f32 %v1189_v19, %v1119_v10 }
 0x32d   :  { %1290 = vmatmul.f32.vlgmr.msra.gmra.mxu2 %v1289_v20  ;;  %1359 = vmatmul.f32.gmra.mxu3 %v1293_v17  ;;  %v1294_v23 = vsub.f32 %v1257_v14, %v1293_v17 }
 0x32e   :  { %v1235_v26 = vadd.f32 %v1234_v18, %v1190_v21 }
 0x32f   :  { %1402 = vmatmul.f32.gmra.mxu0 %v1294_v23  ;;  %v1295_v29 = vand.u32 4294901760, %v1294_v23 }
 0x330   :  { %v1243_v33 = vmax.f32 %v1235_v26, 0.0 }
 0x331   :  { %1445 = vmatmul.f32.gmra.mxu1 %v1295_v29  ;;  %v1296_v35 = vsub.f32 %v1294_v23, %v1295_v29 }
 0x332   :  { %v1260_v45 = vsel %vm305_vm2, %v1243_v33, 0 }
 0x333   :  { %v1301_v25 = vand.u32 4294901760, %v1260_v45  ;;  %v1193_v27 = vpop.f32.mrf.mxu0  ;;  %v1297_v28 = vand.u32 4294901760, %v1296_v35 }
 0x334   :  { %v1194_v30 = vadd.f32 %v1193_v27, %v1125_v39 }
 0x335   :  { %1298 = vmatmul.f32.gmra.mxu2 %v1297_v28  ;;  %1363 = vmatmul.f32.gmra.mxu3 %v1301_v25  ;;  %v1302_v32 = vsub.f32 %v1260_v45, %v1301_v25 }
 0x336   :  { %v1239_v36 = vadd.f32 %v1238_v31, %v1194_v30 }
 0x337   :  { %1407 = vmatmul.f32.gmra.mxu0 %v1302_v32  ;;  %v1303_v37 = vand.u32 4294901760, %v1302_v32 }
 0x338   :  { %v1244_v38 = vmax.f32 %v1239_v36, 0.0 }
 0x339   :  { %1451 = vmatmul.f32.gmra.mxu1 %v1303_v37  ;;  %v1304_v40 = vsub.f32 %v1302_v32, %v1303_v37 }
 0x33a   :  { %v1263_v41 = vsel %vm305_vm2, %v1244_v38, 0 }
 0x33b   :  { %v1309_v42 = vand.u32 4294901760, %v1263_v41  ;;  %v1305_v43 = vand.u32 4294901760, %v1304_v40 }
 0x33d   :  { %1306 = vmatmul.f32.gmra.mxu2 %v1305_v43  ;;  %1367 = vmatmul.f32.gmra.mxu3 %v1309_v42  ;;  %v1310_v44 = vsub.f32 %v1263_v41, %v1309_v42 }
 0x33f   :  { %1412 = vmatmul.f32.gmra.mxu0 %v1310_v44  ;;  %v1311_v47 = vand.u32 4294901760, %v1310_v44 }
 0x341   :  { %1457 = vmatmul.f32.gmra.mxu1 %v1311_v47  ;;  %v1312_v6 = vsub.f32 %v1310_v44, %v1311_v47 }
 0x343   :  { %v1313_v7 = vand.u32 4294901760, %v1312_v6  ;;  %v1641_v6 = vld [vmem:[#allocation3] ss:$0 sm:$0xff] }
 0x345   :  { %1314 = vmatmul.f32.gmra.mxu2 %v1313_v7  ;;  %1527 = vmatmul.f32.vlgmr.msrb.gmra.mxu3 %v1285_v61 }
 0x34d   :  { %1490 = vmatmul.f32.vlgmr.msrb.gmra.mxu2 %v1285_v61  ;;  %1531 = vmatmul.f32.gmra.mxu3 %v1293_v17 }
 0x355   :  { %1494 = vmatmul.f32.gmra.mxu2 %v1293_v17  ;;  %1535 = vmatmul.f32.gmra.mxu3 %v1301_v25 }
 0x35d   :  { %1498 = vmatmul.f32.gmra.mxu2 %v1301_v25  ;;  %1539 = vmatmul.f32.gmra.mxu3 %v1309_v42 }
 0x365   :  { %1502 = vmatmul.f32.gmra.mxu2 %v1309_v42 }
 0x3a4   :  { %v1398_v52 = vpop.f32.mrf.mxu0 }
 0x3a6   :  { %v1440_v54 = vpop.f32.mrf.mxu1 }
 0x3a8   :  { %v1356_v12 = vpop.f32.mrf.mxu3 }
 0x3ac   :  { %v1403_v59 = vpop.f32.mrf.mxu0 }
 0x3ae   :  { %v1446_v1 = vpop.f32.mrf.mxu1 }
 0x3b0   :  { %v1291_v13 = vpop.f32.mrf.mxu2  ;;  %v1360_v15 = vpop.f32.mrf.mxu3 }
 0x3b1   :  { %v1292_v51 = vadd.f32 %v1639_v48, %v1291_v13 }
 0x3b3   :  { %v1357_v53 = vadd.f32 %v1356_v12, %v1292_v51 }
 0x3b4   :  { %v1408_v17 = vpop.f32.mrf.mxu0 }
 0x3b5   :  { %v1399_v57 = vadd.f32 %v1398_v52, %v1357_v53 }
 0x3b6   :  { %v1452_v24 = vpop.f32.mrf.mxu1 }
 0x3b7   :  { %v1441_v62 = vadd.f32 %v1440_v54, %v1399_v57 }
 0x3b8   :  { %v1299_v16 = vpop.f32.mrf.mxu2  ;;  %v1364_v46 = vpop.f32.mrf.mxu3 }
 0x3b9   :  { %v1300_v56 = vadd.f32 %v1639_v48, %v1299_v16  ;;  %v1586_v16 = vlaneseq }
 0x3bb   :  { %v1361_v61 = vadd.f32 %v1360_v15, %v1300_v56  ;;  %v1587_v53 = vand.u32 127, %v1586_v16 }
 0x3bc   :  { %v1413_v27 = vpop.f32.mrf.mxu0 }
 0x3bd   :  { %v1404_v4 = vadd.f32 %v1403_v59, %v1361_v61  ;;  %v1589_v54 = vadd.s32 4294967288, %v1587_v53 }
 0x3be   :  { %v1458_v32 = vpop.f32.mrf.mxu1 }
 0x3bf   :  { %v1447_v11 = vadd.f32 %v1446_v1, %v1404_v4 }
 0x3c0   :  { %v1307_v49 = vpop.f32.mrf.mxu2  ;;  %v1368_v50 = vpop.f32.mrf.mxu3 }
 0x3c1   :  { %v1308_v2 = vadd.f32 %v1639_v48, %v1307_v49 }
 0x3c3   :  { %v1365_v10 = vadd.f32 %v1364_v46, %v1308_v2 }
 0x3c5   :  { %v1409_v23 = vadd.f32 %v1408_v17, %v1365_v10 }
 0x3c7   :  { %v1453_v33 = vadd.f32 %v1452_v24, %v1409_v23 }
 0x3c8   :  { %v1315_v55 = vpop.f32.mrf.mxu2  ;;  %v1528_v58 = vpop.f32.mrf.mxu3 }
 0x3c9   :  { %v1316_v21 = vadd.f32 %v1639_v48, %v1315_v55 }
 0x3cb   :  { %v1369_v29 = vadd.f32 %v1368_v50, %v1316_v21 }
 0x3cd   :  { %v1414_v30 = vadd.f32 %v1413_v27, %v1369_v29 }
 0x3cf   :  { %v1459_v36 = vadd.f32 %v1458_v32, %v1414_v30 }
 0x3d0   :  { %v1491_v63 = vpop.f32.mrf.mxu2  ;;  %v1532_v9 = vpop.f32.mrf.mxu3 }
 0x3d1   :  { %v1492_v0 = vadd.f32 %v1491_v63, %v1441_v62 }
 0x3d3   :  { %v1529_v3 = vadd.f32 %v1528_v58, %v1492_v0 }
 0x3d5   :  { %v1543_v8 = vmax.f32 %v1529_v3, 0.0 }
 0x3d7   :  { %v1551_v14 = vmul.f32 %v1640_v5, %v1543_v8 }
 0x3d8   :  { %v1495_v18 = vpop.f32.mrf.mxu2  ;;  %v1536_v35 = vpop.f32.mrf.mxu3 }
 0x3d9   :  { %v1496_v19 = vadd.f32 %v1495_v18, %v1447_v11  ;;  %v1555_v20 = vsel %vm305_vm2, %v1551_v14, 0.0 }
 0x3da   :  { %1556 = vadd.xlane.f32.xlu1 %v1555_v20 }
 0x3db   :  { %v1533_v22 = vadd.f32 %v1532_v9, %v1496_v19 }
 0x3dd   :  { %v1544_v26 = vmax.f32 %v1533_v22, 0.0 }
 0x3df   :  { %v1552_v34 = vmul.f32 %v1640_v5, %v1544_v26 }
 0x3e0   :  { %v1499_v39 = vpop.f32.mrf.mxu2  ;;  %v1540_v42 = vpop.f32.mrf.mxu3 }
 0x3e1   :  { %v1500_v45 = vadd.f32 %v1499_v39, %v1453_v33  ;;  %v1558_v25 = vsel %vm305_vm2, %v1552_v34, 0.0 }
 0x3e2   :  { %1559 = vadd.xlane.f32.xlu2 %v1558_v25 }
 0x3e3   :  { %v1537_v28 = vadd.f32 %v1536_v35, %v1500_v45 }
 0x3e5   :  { %v1545_v31 = vmax.f32 %v1537_v28, 0.0 }
 0x3e7   :  { %v1553_v37 = vmul.f32 %v1640_v5, %v1545_v31 }
 0x3e8   :  { %v1503_v38 = vpop.f32.mrf.mxu2 }
 0x3e9   :  { %v1504_v40 = vadd.f32 %v1503_v38, %v1459_v36  ;;  %v1561_v41 = vsel %vm305_vm2, %v1553_v37, 0.0 }
 0x3ea   :  { %1562 = vadd.xlane.f32.xlu0 %v1561_v41 }
 0x3eb   :  { %v1541_v43 = vadd.f32 %v1540_v42, %v1504_v40 }
 0x3ed   :  { %v1546_v44 = vmax.f32 %v1541_v43, 0.0 }
 0x3ef   :  { %v1554_v47 = vmul.f32 %v1640_v5, %v1546_v44 }
 0x3f1   :  { %v1564_v7 = vsel %vm305_vm2, %v1554_v47, 0.0 }
 0x3f2   :  { %1565 = vadd.xlane.f32.xlu2 %v1564_v7 }
 0x3f3   :  { %1571 = vperm.xlu1 %1634, %v1641_v6  }
 0x44d   :  { %v1557_v12 = vpop.xlane.xlu1 %1556 }
 0x455   :  { %v1560_v13 = vpop.xlane.xlu2 %1559 }
 0x45d   :  { %v1563_v15 = vpop.xlane.xlu0 %1562 }
 0x465   :  { %v1566_v46 = vpop.xlane.xlu2 %1565  ;;  %v1572_v48 = vpop.permute.xlu1 %1571 }
 0x466   :  { %v1574_v49 = vadd.f32 %v1572_v48, %v1557_v12  ;;  %v1575_v50 = vadd.f32 %v1572_v48, %v1560_v13  ;;  %v1576_v51 = vadd.f32 %v1572_v48, %v1563_v15  ;;  %v1577_v52 = vadd.f32 %v1572_v48, %v1566_v46 }
 0x468   :  { %1642 = vtanh.f32 %v1574_v49 }
 0x469   :  { %1644 = vtanh.f32 %v1575_v50 }
 0x46a   :  { %1646 = vtanh.f32 %v1576_v51 }
 0x46b   :  { %1648 = vtanh.f32 %v1577_v52 }
 0x46e   :  { %v1643_v55 = vpop.eup %1642 }
 0x46f   :  { %v1645_v56 = vpop.eup %1644  ;;  %v1588_v57 = vperm.slane %v1643_v55, %v1587_v53 }
 0x470   :  { %v1647_v58 = vpop.eup %1646  ;;  %v1590_v59 = vperm.slane %v1645_v56, %v1589_v54 }
 0x471   :  { %v1649_v60 = vpop.eup %1648  ;;  %v1593_v61 = vperm.slane %v1647_v58, %v1587_v53 }
 0x472   :  { %v1594_v62 = vperm.slane %v1649_v60, %v1589_v54  ;;  %v1592_v63 = vsel %vm1591_vm5, %v1590_v59, %v1588_v57 }
 0x474   :  { %v1595_v0 = vsel %vm1591_vm5, %v1594_v62, %v1593_v61 }
 0x475   :  { %v1597_v1 = vsel %vm1596_vm6, %v1595_v0, %v1592_v63 }
 0x476   :  { %1600 = vst.msk [vmem:[#allocation4] sm:$0x3] %vm1599_vm7, %v1597_v1 }
 0x477   :  { %1611 = dma.vmem_to_hbm [thread:$0]  %s1607_s10, 32, %s1609_s13, [#allocation5]  }
 0x478   :  { %1674 = dma.done.wait [#allocation5], 32  }
 0x479   :  { %1675 = vsyncadd [#allocation5], 4294967264 }
 0x47a   :  { %1616 = vsyncpa [#allocation5], 1 }

</bundles_post_ra>
